<compile_context>
chip_gen: v7x
topology: tpu7x:2x2x1
jax: 0.10.0
libtpu: 0.0.40
codegen_flags: <defaults>
</compile_context>

<pallas_src>
import jax
import jax.numpy as jnp
from jax import lax
from jax.experimental import pallas as pl
from jax.experimental.pallas import tpu as pltpu


def _make_supcon_kernel(*, tm, tn, n_valid, inv_temp, loss_scale, from_labels, has_padding):
    """Builds the tiled SupCon kernel.

    Inputs (from_labels=True):  lab_rows [tm,1] i32, lab_cols [1,tn] i32, pc [tm,1] f32,
                                q [tm,D], k [tn,D]
    Inputs (from_labels=False): mask_tile [tm,tn] i8, pc [tm,1] f32, q [tm,D], k [tn,D]
    Output: per-anchor loss [tm,1] f32 (written on the last column step).
    Scratch: running max / masked exp-sum / sum(mask*sim) [tm,1] f32, scaled-q [tm,D].
    """

    def kernel(*refs):
        if from_labels:
            (lab_r_ref, lab_c_ref, pc_ref, q_ref, k_ref,
             o_ref, m_ref, l_ref, ps_ref, qs_ref) = refs
        else:
            (mask_ref, pc_ref, q_ref, k_ref,
             o_ref, m_ref, l_ref, ps_ref, qs_ref) = refs

        j = pl.program_id(1)
        last_j = pl.num_programs(1) - 1

        @pl.when(j == 0)
        def _init():
            m_ref[...] = jnp.full_like(m_ref, -jnp.inf)
            l_ref[...] = jnp.zeros_like(l_ref)
            ps_ref[...] = jnp.zeros_like(ps_ref)
            # Fold 1/T into the row-tile-resident q operand once per row tile
            # (scale in f32, then cast back to the compute dtype).
            qs_ref[...] = (q_ref[...].astype(jnp.float32) * inv_temp).astype(qs_ref.dtype)

        # --- similarity tile on the MXU: (q/T) @ k^T, f32 accumulation ---
        sim = lax.dot_general(qs_ref[...], k_ref[...], (((1,), (1,)), ((), ())),
                              preferred_element_type=jnp.float32)      # [tm, tn] f32

        # --- online log-sum-exp bookkeeping ---
        m_prev = m_ref[...]
        m_new = jnp.maximum(m_prev, jnp.max(sim, axis=1, keepdims=True))
        alpha = jnp.exp(m_prev - m_new)
        p = jnp.exp(sim - m_new)

        # --- positive-pair mask (boolean, fused into jnp.where; never a f32 tile) ---
        if from_labels:
            pos = lab_r_ref[...] == lab_c_ref[...]                      # [tm, tn] bool
        else:
            pos = mask_ref[...] != 0

        def update(l_add, ps_add):
            l_ref[...] = l_ref[...] * alpha + l_add
            ps_ref[...] = ps_ref[...] + ps_add
            m_ref[...] = m_new

        # Only tiles touching the diagonal (self-contrast) or the padded tail pay
        # for the iota-based mask; all other tiles take the cheap branch.
        r0 = pl.program_id(0) * tm
        c0 = j * tn
        touches_diag = jnp.logical_and(r0 < c0 + tn, c0 < r0 + tm)
        needs_mask = touches_diag
        if has_padding:
            needs_mask = jnp.logical_or(needs_mask, j == last_j)

        @pl.when(needs_mask)
        def _masked_tile():
            rows = lax.broadcasted_iota(jnp.int32, (tm, tn), 0) + r0
            cols = lax.broadcasted_iota(jnp.int32, (tm, tn), 1) + c0
            keep = rows != cols
            if has_padding:
                keep = jnp.logical_and(keep, cols < n_valid)
            l_add = jnp.sum(jnp.where(keep, p, 0.0), axis=1, keepdims=True)
            ps_add = jnp.sum(jnp.where(jnp.logical_and(pos, keep), sim, 0.0),
                             axis=1, keepdims=True)
            update(l_add, ps_add)

        @pl.when(jnp.logical_not(needs_mask))
        def _clean_tile():
            l_add = jnp.sum(p, axis=1, keepdims=True)
            ps_add = jnp.sum(jnp.where(pos, sim, 0.0), axis=1, keepdims=True)
            update(l_add, ps_add)

        # --- finalize on the last column tile ---
        @pl.when(j == last_j)
        def _finalize():
            lse = m_ref[...] + jnp.log(l_ref[...])     # log sum_{j!=i, valid} exp(sim_ij)
            pc = pc_ref[...]
            pc_safe = jnp.where(pc < 1e-6, 1.0, pc)
            # sum_j mask*(sim - lse) / count == mean log-prob over positives
            o_ref[...] = (-loss_scale) * (ps_ref[...] - pc * lse) / pc_safe

    return kernel


def _round_up(x, m):
    return ((x + m - 1) // m) * m


def _pick_tile(n, preferred, align=128):
    """Largest multiple of `align` dividing n (n is a multiple of align), <= preferred."""
    preferred = max(align, min(preferred, n))
    t = (preferred // align) * align
    while t > align and n % t != 0:
        t -= align
    return t


def _default_vmem_limit_bytes():
    try:
        cap = int(pltpu.get_tpu_info().vmem_capacity_bytes)
    except Exception:
        cap = 64 << 20            # conservative fallback: v7x-sized physical VMEM
    # ~75% of physical (48 MiB on v7x, 96 MiB on v5e/v6e), capped at 96 MiB.
    return min((cap * 3) // 4, 96 << 20)


def supcon_loss(features, labels=None, mask=None, *,
                temperature=0.07, base_temperature=0.07,
                block_m=512, block_n=1024,
                compute_dtype=jnp.bfloat16,
                vmem_limit_bytes=None):
    """features: [bsz, n_views, ...]; labels: optional [bsz]; mask: optional [bsz, bsz]."""
    if features.ndim < 3:
        raise ValueError("`features` needs to be [bsz, n_views, ...]")
    if features.ndim > 3:
        features = features.reshape(features.shape[0], features.shape[1], -1)
    if labels is not None and mask is not None:
        raise ValueError("Cannot define both `labels` and `mask`")

    bsz, n_views, dim = features.shape
    n = bsz * n_views

    # torch.cat(torch.unbind(features, dim=1), dim=0) -> view-major [N, D]
    feat = jnp.transpose(features, (1, 0, 2)).reshape(n, dim).astype(compute_dtype)

    from_labels = mask is None
    if from_labels:
        if labels is None:
            base_lab = jnp.arange(bsz, dtype=jnp.int32)       # eye(bsz) == identity labels
        else:
            base_lab = jnp.asarray(labels).reshape(-1).astype(jnp.int32)
            if base_lab.shape[0] != bsz:
                raise ValueError("Num of labels does not match num of features")
        # per-row positive count = n_views * (#same-label samples) - 1 (self-contrast removed)
        same = jnp.sum(base_lab[:, None] == base_lab[None, :], axis=1).astype(jnp.float32)
        pc_b = n_views * same - 1.0
        row_lab = jnp.tile(base_lab, n_views)                  # [n]
        pc = jnp.tile(pc_b, n_views)                           # [n]
    else:
        mask_bb = jnp.asarray(mask, dtype=jnp.float32)
        # TODO(synk): non-binary masks are not supported (kernel treats mask != 0 as positive).
        pc_b = n_views * jnp.sum(mask_bb, axis=1) - jnp.diagonal(mask_bb)
        pc = jnp.tile(pc_b, n_views)
        # TODO(synk): for very large N, rebuild the tile in-kernel from the [bsz,bsz] base
        #             mask instead of streaming the tiled [N,N] int8 mask from HBM.
        full_mask = jnp.tile((mask_bb != 0).astype(jnp.int8), (n_views, n_views))

    # --- pad N to a multiple of 128: keeps tiles lane/MXU aligned; padded columns are
    #     masked out of the exp-sum/positives in-kernel; padded rows dropped from the mean ---
    n_p = _round_up(n, 128)
    n_pad = n_p - n
    if n_pad:
        feat = jnp.pad(feat, ((0, n_pad), (0, 0)))
        pc = jnp.pad(pc, (0, n_pad))
        if from_labels:
            row_lab = jnp.pad(row_lab, (0, n_pad), constant_values=-1)
        else:
            full_mask = jnp.pad(full_mask, ((0, n_pad), (0, n_pad)))
    pc = pc.reshape(n_p, 1).astype(jnp.float32)

    # --- tile selection: 128-aligned, >=2 row tiles when possible (v7x megacore) ---
    tm_target = min(block_m, n_p // 2) if n_p >= 256 else n_p
    tm = _pick_tile(n_p, tm_target)
    tn = _pick_tile(n_p, block_n)

    if vmem_limit_bytes is None:
        vmem_limit_bytes = _default_vmem_limit_bytes()
    cbytes = jnp.dtype(compute_dtype).itemsize

    def vmem_estimate(tm_, tn_):
        est = 2 * (tm_ + tn_) * dim * cbytes      # double-buffered q / k feature tiles
        est += tm_ * dim * cbytes                 # scaled-q scratch
        est += 4 * tm_ * tn_ * 4                  # sim + elementwise f32 temporaries
        if not from_labels:
            est += 2 * tm_ * tn_                  # int8 mask tile (double buffered)
        est += 16 * tm_ * 4                       # small per-row blocks / scratches
        return est

    budget = int(vmem_limit_bytes * 0.7)
    while vmem_estimate(tm, tn) > budget:
        if tn > 128:
            tn = _pick_tile(n_p, tn // 2)
        elif tm > 128:
            tm = _pick_tile(n_p, tm // 2)
        else:
            break

    kernel = _make_supcon_kernel(
        tm=tm, tn=tn, n_valid=n,
        inv_temp=1.0 / temperature,
        loss_scale=temperature / base_temperature,
        from_labels=from_labels,
        has_padding=(n_pad > 0),
    )

    if from_labels:
        in_specs = [
            pl.BlockSpec((tm, 1), lambda i, j: (i, 0)),       # anchor-row labels
            pl.BlockSpec((1, tn), lambda i, j: (0, j)),       # contrast-col labels
            pl.BlockSpec((tm, 1), lambda i, j: (i, 0)),       # precomputed positive counts
            pl.BlockSpec((tm, dim), lambda i, j: (i, 0)),     # anchor features
            pl.BlockSpec((tn, dim), lambda i, j: (j, 0)),     # contrast features
        ]
        inputs = (row_lab.reshape(n_p, 1), row_lab.reshape(1, n_p), pc, feat, feat)
    else:
        in_specs = [
            pl.BlockSpec((tm, tn), lambda i, j: (i, j)),      # int8 positive-mask tile
            pl.BlockSpec((tm, 1), lambda i, j: (i, 0)),
            pl.BlockSpec((tm, dim), lambda i, j: (i, 0)),
            pl.BlockSpec((tn, dim), lambda i, j: (j, 0)),
        ]
        inputs = (full_mask, pc, feat, feat)

    per_row_loss = pl.pallas_call(
        kernel,
        out_shape=jax.ShapeDtypeStruct((n_p, 1), jnp.float32),
        grid_spec=pltpu.PrefetchScalarGridSpec(
            num_scalar_prefetch=0,
            grid=(n_p // tm, n_p // tn),
            in_specs=in_specs,
            out_specs=pl.BlockSpec((tm, 1), lambda i, j: (i, 0)),
            scratch_shapes=[pltpu.VMEM((tm, 1), jnp.float32)] * 3
                         + [pltpu.VMEM((tm, dim), compute_dtype)],
        ),
        compiler_params=pltpu.CompilerParams(
            dimension_semantics=("parallel", "arbitrary"),
            vmem_limit_bytes=int(vmem_limit_bytes),
        ),
    )(*inputs)

    # loss.view(num_view, batch).mean() == mean over all real (non-padded) anchors
    return jnp.mean(per_row_loss[:n, 0])


def _supcon_loss_ref(features, labels=None, mask=None,
                     temperature=0.07, base_temperature=0.07,
                     matmul_dtype=jnp.float32):
    """Pure-JAX reference mirroring the PyTorch forward (single device).

    matmul_dtype mirrors the kernel's quantization (q scaled by 1/T then cast)."""
    bsz, n_views, _ = features.shape
    if labels is None and mask is None:
        mask_bb = jnp.eye(bsz, dtype=jnp.float32)
    elif labels is not None:
        labels = jnp.asarray(labels).reshape(-1, 1)
        mask_bb = (labels == labels.T).astype(jnp.float32)
    else:
        mask_bb = jnp.asarray(mask, jnp.float32)
    n = bsz * n_views
    feat = jnp.transpose(features, (1, 0, 2)).reshape(n, -1).astype(jnp.float32)
    q = (feat.astype(matmul_dtype).astype(jnp.float32) / temperature).astype(matmul_dtype)
    k = feat.astype(matmul_dtype)
    sim = lax.dot_general(q, k, (((1,), (1,)), ((), ())),
                          preferred_element_type=jnp.float32,
                          precision=lax.Precision.HIGHEST)
    logits = sim - jnp.max(sim, axis=1, keepdims=True)
    logits_mask = 1.0 - jnp.eye(n, dtype=jnp.float32)
    full_mask = jnp.tile(mask_bb, (n_views, n_views)) * logits_mask
    exp_logits = jnp.exp(logits) * logits_mask
    log_prob = logits - jnp.log(jnp.sum(exp_logits, axis=1, keepdims=True))
    pos = jnp.sum(full_mask, axis=1)
    pos = jnp.where(pos < 1e-6, 1.0, pos)
    mean_log_prob_pos = jnp.sum(full_mask * log_prob, axis=1) / pos
    return jnp.mean(-(temperature / base_temperature) * mean_log_prob_pos)


if __name__ == "__main__":
    key = jax.random.PRNGKey(0)
    k1, k2, k3, k4 = jax.random.split(key, 4)

    def normed_feats(k, bsz, n_views, dim):
        f = jax.random.normal(k, (bsz, n_views, dim), dtype=jnp.float32)
        return f / jnp.linalg.norm(f, axis=-1, keepdims=True)

    checks = []

    # --- small shapes (single padded 128x128 tile; exercises padding masking) ---
    feats = normed_feats(k1, 4, 2, 32)
    labels = jax.random.randint(k2, (4,), 0, 2)
    explicit_mask = (labels[:, None] == labels[None, :]).astype(jnp.float32)
    for kwargs in ({"labels": labels}, {}, {"mask": explicit_mask}):
        got = supcon_loss(feats, compute_dtype=jnp.float32, **kwargs)
        want = _supcon_loss_ref(feats, **kwargs)
        checks.append((got, want, 1e-4))
    # default bf16 compute path (checked against a bf16-matched reference)
    got = supcon_loss(feats, labels=labels)
    want = _supcon_loss_ref(feats, labels=labels, matmul_dtype=jnp.bfloat16)
    checks.append((got, want, 5e-3))

    # --- multi-tile grid (2x2): online LSE across column tiles + diag gating + megacore split ---
    feats2 = normed_feats(k3, 128, 2, 64)
    labels2 = jax.random.randint(k4, (128,), 0, 10)
    got = supcon_loss(feats2, labels=labels2, block_m=128, block_n=128, compute_dtype=jnp.float32)
    checks.append((got, _supcon_loss_ref(feats2, labels=labels2), 5e-4))
    got = supcon_loss(feats2, labels=labels2, block_m=128, block_n=128)
    checks.append((got, _supcon_loss_ref(feats2, labels=labels2, matmul_dtype=jnp.bfloat16), 5e-3))

    # --- non-multiple-of-128 N (bsz=100, n_views=2 -> N=200, padded to 256) ---
    feats3 = normed_feats(k1, 100, 2, 48)
    labels3 = jax.random.randint(k2, (100,), 0, 7)
    got = supcon_loss(feats3, labels=labels3, block_m=128, block_n=128, compute_dtype=jnp.float32)
    checks.append((got, _supcon_loss_ref(feats3, labels=labels3), 5e-4))

    for got, want, tol in checks:
        jax.block_until_ready(got)
        assert jnp.allclose(got, want, atol=tol, rtol=tol), (got, want, tol)

    print("KERNEL_OK")
</pallas_src>

<mosaic_0001>
module attributes {stable_mosaic.version = 11 : i64} {
  func.func @kernel(%arg0: i32, %arg1: i32, %arg2: memref<128x1xi32, #tpu.memory_space<vmem>>, %arg3: memref<1x128xi32, #tpu.memory_space<vmem>>, %arg4: memref<128x1xf32, #tpu.memory_space<vmem>>, %arg5: memref<128x32xf32, #tpu.memory_space<vmem>>, %arg6: memref<128x32xf32, #tpu.memory_space<vmem>>, %arg7: memref<128x1xf32, #tpu.memory_space<vmem>>, %arg8: memref<128x1xf32, #tpu.memory_space<vmem>>, %arg9: memref<128x1xf32, #tpu.memory_space<vmem>>, %arg10: memref<128x1xf32, #tpu.memory_space<vmem>>, %arg11: memref<128x32xf32, #tpu.memory_space<vmem>>) attributes {dimension_semantics = [#tpu.dimension_semantics<parallel>, #tpu.dimension_semantics<arbitrary>], iteration_bounds = array<i64: 1, 1>, scalar_prefetch = 0 : i64, scratch_operands = 4 : i64, tpu.core_type = #tpu.core_type<tc>, window_params = [{transform_indices = @transform_0, window_bounds = array<i64: 128, 1>}, {transform_indices = @transform_1, window_bounds = array<i64: 1, 128>}, {transform_indices = @transform_2, window_bounds = array<i64: 128, 1>}, {transform_indices = @transform_3, window_bounds = array<i64: 128, 32>}, {transform_indices = @transform_4, window_bounds = array<i64: 128, 32>}, {transform_indices = @transform_5, window_bounds = array<i64: 128, 1>}]} {
    %c0_i32 = arith.constant 0 : i32
    %0 = arith.cmpi eq, %arg1, %c0_i32 : i32
    %1 = arith.extui %0 : i1 to i32
    %c0_i32_0 = arith.constant 0 : i32
    %2 = arith.cmpi ne, %1, %c0_i32_0 : i32
    scf.if %2 {
      %cst_19 = arith.constant 0xFF800000 : f32
      %37 = vector.broadcast %cst_19 : f32 to vector<128x1xf32>
      %c0_20 = arith.constant 0 : index
      %c0_21 = arith.constant 0 : index
      %38 = vector.load %arg8[%c0_20, %c0_21] : memref<128x1xf32, #tpu.memory_space<vmem>>, vector<128x1xf32>
      tpu.vector_store %arg8[%c0_20, %c0_21], %37 {strides = array<i32>} : memref<128x1xf32, #tpu.memory_space<vmem>>, vector<128x1xf32>,
      %cst_22 = arith.constant 0.000000e+00 : f32
      %39 = vector.broadcast %cst_22 : f32 to vector<128x1xf32>
      %c0_23 = arith.constant 0 : index
      %c0_24 = arith.constant 0 : index
      %40 = vector.load %arg9[%c0_23, %c0_24] : memref<128x1xf32, #tpu.memory_space<vmem>>, vector<128x1xf32>
      tpu.vector_store %arg9[%c0_23, %c0_24], %39 {strides = array<i32>} : memref<128x1xf32, #tpu.memory_space<vmem>>, vector<128x1xf32>,
      %cst_25 = arith.constant 0.000000e+00 : f32
      %41 = vector.broadcast %cst_25 : f32 to vector<128x1xf32>
      %c0_26 = arith.constant 0 : index
      %c0_27 = arith.constant 0 : index
      %42 = vector.load %arg10[%c0_26, %c0_27] : memref<128x1xf32, #tpu.memory_space<vmem>>, vector<128x1xf32>
      tpu.vector_store %arg10[%c0_26, %c0_27], %41 {strides = array<i32>} : memref<128x1xf32, #tpu.memory_space<vmem>>, vector<128x1xf32>,
      %c0_28 = arith.constant 0 : index
      %c0_29 = arith.constant 0 : index
      %43 = vector.load %arg5[%c0_28, %c0_29] : memref<128x32xf32, #tpu.memory_space<vmem>>, vector<128x32xf32>
      %cst_30 = arith.constant 14.2857141 : f32
      %44 = vector.broadcast %cst_30 : f32 to vector<128x32xf32>
      %45 = arith.mulf %43, %44 : vector<128x32xf32>
      %c0_31 = arith.constant 0 : index
      %c0_32 = arith.constant 0 : index
      %46 = vector.load %arg11[%c0_31, %c0_32] : memref<128x32xf32, #tpu.memory_space<vmem>>, vector<128x32xf32>
      tpu.vector_store %arg11[%c0_31, %c0_32], %45 {strides = array<i32>} : memref<128x32xf32, #tpu.memory_space<vmem>>, vector<128x32xf32>,
    } else {
    }
    %c0 = arith.constant 0 : index
    %c0_1 = arith.constant 0 : index
    %3 = vector.load %arg11[%c0, %c0_1] : memref<128x32xf32, #tpu.memory_space<vmem>>, vector<128x32xf32>
    %c0_2 = arith.constant 0 : index
    %c0_3 = arith.constant 0 : index
    %4 = vector.load %arg6[%c0_2, %c0_3] : memref<128x32xf32, #tpu.memory_space<vmem>>, vector<128x32xf32>
    %cst = arith.constant dense<0.000000e+00> : vector<128x128xf32>
    %5 = tpu.matmul %3, %4, %cst {dimension_numbers = #tpu.dot_dimension_numbers<[1], [1], [0], [0], [0, 0, 1, 0], [], []>} : vector<128x32xf32>, vector<128x32xf32>, vector<128x128xf32> -> vector<128x128xf32>
    %c0_4 = arith.constant 0 : index
    %c0_5 = arith.constant 0 : index
    %6 = vector.load %arg8[%c0_4, %c0_5] : memref<128x1xf32, #tpu.memory_space<vmem>>, vector<128x1xf32>
    %cst_6 = arith.constant dense<0xFF800000> : vector<128xf32>
    %7 = vector.multi_reduction <maximumf>, %5, %cst_6 [1] : vector<128x128xf32> to vector<128xf32>
    %8 = vector.shape_cast %7 : vector<128xf32> to vector<128x1xf32>
    %9 = arith.maximumf %6, %8 : vector<128x1xf32>
    %10 = arith.subf %6, %9 : vector<128x1xf32>
    %11 = math.exp %10 : vector<128x1xf32>
    %12 = vector.broadcast %9 : vector<128x1xf32> to vector<128x128xf32>
    %13 = arith.subf %5, %12 : vector<128x128xf32>
    %14 = math.exp %13 : vector<128x128xf32>
    %c0_7 = arith.constant 0 : index
    %c0_8 = arith.constant 0 : index
    %15 = vector.load %arg2[%c0_7, %c0_8] : memref<128x1xi32, #tpu.memory_space<vmem>>, vector<128x1xi32>
    %c0_9 = arith.constant 0 : index
    %c0_10 = arith.constant 0 : index
    %16 = vector.load %arg3[%c0_9, %c0_10] : memref<1x128xi32, #tpu.memory_space<vmem>>, vector<1x128xi32>
    %17 = vector.broadcast %15 : vector<128x1xi32> to vector<128x128xi32>
    %18 = vector.broadcast %16 : vector<1x128xi32> to vector<128x128xi32>
    %19 = arith.cmpi eq, %17, %18 : vector<128x128xi32>
    %c128_i32 = arith.constant 128 : i32
    %20 = arith.muli %arg0, %c128_i32 : i32
    %c128_i32_11 = arith.constant 128 : i32
    %21 = arith.muli %arg1, %c128_i32_11 : i32
    %c128_i32_12 = arith.constant 128 : i32
    %22 = arith.addi %21, %c128_i32_12 : i32
    %23 = arith.cmpi slt, %20, %22 : i32
    %c128_i32_13 = arith.constant 128 : i32
    %24 = arith.addi %20, %c128_i32_13 : i32
    %25 = arith.cmpi slt, %21, %24 : i32
    %26 = arith.andi %23, %25 : i1
    %c0_i32_14 = arith.constant 0 : i32
    %27 = arith.cmpi eq, %arg1, %c0_i32_14 : i32
    %28 = arith.ori %26, %27 : i1
    %29 = arith.extui %28 : i1 to i32
    %c0_i32_15 = arith.constant 0 : i32
    %30 = arith.cmpi ne, %29, %c0_i32_15 : i32
    scf.if %30 {
      %37 = tpu.iota {dimensions = array<i32: 0>} : vector<128x128xi32>
      %38 = vector.broadcast %20 : i32 to vector<128x128xi32>
      %39 = arith.addi %37, %38 : vector<128x128xi32>
      %40 = tpu.iota {dimensions = array<i32: 1>} : vector<128x128xi32>
      %41 = vector.broadcast %21 : i32 to vector<128x128xi32>
      %42 = arith.addi %40, %41 : vector<128x128xi32>
      %43 = arith.cmpi ne, %39, %42 : vector<128x128xi32>
      %c8_i32 = arith.constant 8 : i32
      %44 = vector.broadcast %c8_i32 : i32 to vector<128x128xi32>
      %45 = arith.cmpi slt, %42, %44 : vector<128x128xi32>
      %46 = arith.andi %43, %45 : vector<128x128xi1>
      %cst_19 = arith.constant 0.000000e+00 : f32
      %47 = vector.broadcast %cst_19 : f32 to vector<128x128xf32>
      %48 = arith.select %46, %14, %47 : vector<128x128xi1>, vector<128x128xf32>
      %cst_20 = arith.constant dense<0.000000e+00> : vector<128xf32>
      %49 = vector.multi_reduction <add>, %48, %cst_20 [1] : vector<128x128xf32> to vector<128xf32>
      %50 = vector.shape_cast %49 : vector<128xf32> to vector<128x1xf32>
      %51 = arith.andi %19, %46 : vector<128x128xi1>
      %cst_21 = arith.constant 0.000000e+00 : f32
      %52 = vector.broadcast %cst_21 : f32 to vector<128x128xf32>
      %53 = arith.select %51, %5, %52 : vector<128x128xi1>, vector<128x128xf32>
      %cst_22 = arith.constant dense<0.000000e+00> : vector<128xf32>
      %54 = vector.multi_reduction <add>, %53, %cst_22 [1] : vector<128x128xf32> to vector<128xf32>
      %55 = vector.shape_cast %54 : vector<128xf32> to vector<128x1xf32>
      %c0_23 = arith.constant 0 : index
      %c0_24 = arith.constant 0 : index
      %56 = vector.load %arg9[%c0_23, %c0_24] : memref<128x1xf32, #tpu.memory_space<vmem>>, vector<128x1xf32>
      %57 = arith.mulf %56, %11 : vector<128x1xf32>
      %58 = arith.addf %57, %50 : vector<128x1xf32>
      %c0_25 = arith.constant 0 : index
      %c0_26 = arith.constant 0 : index
      %59 = vector.load %arg9[%c0_25, %c0_26] : memref<128x1xf32, #tpu.memory_space<vmem>>, vector<128x1xf32>
      tpu.vector_store %arg9[%c0_25, %c0_26], %58 {strides = array<i32>} : memref<128x1xf32, #tpu.memory_space<vmem>>, vector<128x1xf32>,
      %c0_27 = arith.constant 0 : index
      %c0_28 = arith.constant 0 : index
      %60 = vector.load %arg10[%c0_27, %c0_28] : memref<128x1xf32, #tpu.memory_space<vmem>>, vector<128x1xf32>
      %61 = arith.addf %60, %55 : vector<128x1xf32>
      %c0_29 = arith.constant 0 : index
      %c0_30 = arith.constant 0 : index
      %62 = vector.load %arg10[%c0_29, %c0_30] : memref<128x1xf32, #tpu.memory_space<vmem>>, vector<128x1xf32>
      tpu.vector_store %arg10[%c0_29, %c0_30], %61 {strides = array<i32>} : memref<128x1xf32, #tpu.memory_space<vmem>>, vector<128x1xf32>,
      %c0_31 = arith.constant 0 : index
      %c0_32 = arith.constant 0 : index
      %63 = vector.load %arg8[%c0_31, %c0_32] : memref<128x1xf32, #tpu.memory_space<vmem>>, vector<128x1xf32>
      tpu.vector_store %arg8[%c0_31, %c0_32], %9 {strides = array<i32>} : memref<128x1xf32, #tpu.memory_space<vmem>>, vector<128x1xf32>,
    } else {
    }
    %true = arith.constant true
    %31 = arith.xori %28, %true : i1
    %32 = arith.extui %31 : i1 to i32
    %c0_i32_16 = arith.constant 0 : i32
    %33 = arith.cmpi ne, %32, %c0_i32_16 : i32
    scf.if %33 {
      %cst_19 = arith.constant dense<0.000000e+00> : vector<128xf32>
      %37 = vector.multi_reduction <add>, %14, %cst_19 [1] : vector<128x128xf32> to vector<128xf32>
      %38 = vector.shape_cast %37 : vector<128xf32> to vector<128x1xf32>
      %cst_20 = arith.constant 0.000000e+00 : f32
      %39 = vector.broadcast %cst_20 : f32 to vector<128x128xf32>
      %40 = arith.select %19, %5, %39 : vector<128x128xi1>, vector<128x128xf32>
      %cst_21 = arith.constant dense<0.000000e+00> : vector<128xf32>
      %41 = vector.multi_reduction <add>, %40, %cst_21 [1] : vector<128x128xf32> to vector<128xf32>
      %42 = vector.shape_cast %41 : vector<128xf32> to vector<128x1xf32>
      %c0_22 = arith.constant 0 : index
      %c0_23 = arith.constant 0 : index
      %43 = vector.load %arg9[%c0_22, %c0_23] : memref<128x1xf32, #tpu.memory_space<vmem>>, vector<128x1xf32>
      %44 = arith.mulf %43, %11 : vector<128x1xf32>
      %45 = arith.addf %44, %38 : vector<128x1xf32>
      %c0_24 = arith.constant 0 : index
      %c0_25 = arith.constant 0 : index
      %46 = vector.load %arg9[%c0_24, %c0_25] : memref<128x1xf32, #tpu.memory_space<vmem>>, vector<128x1xf32>
      tpu.vector_store %arg9[%c0_24, %c0_25], %45 {strides = array<i32>} : memref<128x1xf32, #tpu.memory_space<vmem>>, vector<128x1xf32>,
      %c0_26 = arith.constant 0 : index
      %c0_27 = arith.constant 0 : index
      %47 = vector.load %arg10[%c0_26, %c0_27] : memref<128x1xf32, #tpu.memory_space<vmem>>, vector<128x1xf32>
      %48 = arith.addf %47, %42 : vector<128x1xf32>
      %c0_28 = arith.constant 0 : index
      %c0_29 = arith.constant 0 : index
      %49 = vector.load %arg10[%c0_28, %c0_29] : memref<128x1xf32, #tpu.memory_space<vmem>>, vector<128x1xf32>
      tpu.vector_store %arg10[%c0_28, %c0_29], %48 {strides = array<i32>} : memref<128x1xf32, #tpu.memory_space<vmem>>, vector<128x1xf32>,
      %c0_30 = arith.constant 0 : index
      %c0_31 = arith.constant 0 : index
      %50 = vector.load %arg8[%c0_30, %c0_31] : memref<128x1xf32, #tpu.memory_space<vmem>>, vector<128x1xf32>
      tpu.vector_store %arg8[%c0_30, %c0_31], %9 {strides = array<i32>} : memref<128x1xf32, #tpu.memory_space<vmem>>, vector<128x1xf32>,
    } else {
    }
    %c0_i32_17 = arith.constant 0 : i32
    %34 = arith.cmpi eq, %arg1, %c0_i32_17 : i32
    %35 = arith.extui %34 : i1 to i32
    %c0_i32_18 = arith.constant 0 : i32
    %36 = arith.cmpi ne, %35, %c0_i32_18 : i32
    scf.if %36 {
      %c0_19 = arith.constant 0 : index
      %c0_20 = arith.constant 0 : index
      %37 = vector.load %arg8[%c0_19, %c0_20] : memref<128x1xf32, #tpu.memory_space<vmem>>, vector<128x1xf32>
      %c0_21 = arith.constant 0 : index
      %c0_22 = arith.constant 0 : index
      %38 = vector.load %arg9[%c0_21, %c0_22] : memref<128x1xf32, #tpu.memory_space<vmem>>, vector<128x1xf32>
      %39 = math.log %38 : vector<128x1xf32>
      %40 = arith.addf %37, %39 : vector<128x1xf32>
      %c0_23 = arith.constant 0 : index
      %c0_24 = arith.constant 0 : index
      %41 = vector.load %arg4[%c0_23, %c0_24] : memref<128x1xf32, #tpu.memory_space<vmem>>, vector<128x1xf32>
      %cst_25 = arith.constant 9.99999997E-7 : f32
      %42 = vector.broadcast %cst_25 : f32 to vector<128x1xf32>
      %43 = arith.cmpf olt, %41, %42 : vector<128x1xf32>
      %cst_26 = arith.constant 1.000000e+00 : f32
      %44 = vector.broadcast %cst_26 : f32 to vector<128x1xf32>
      %45 = arith.select %43, %44, %41 : vector<128x1xi1>, vector<128x1xf32>
      %c0_27 = arith.constant 0 : index
      %c0_28 = arith.constant 0 : index
      %46 = vector.load %arg10[%c0_27, %c0_28] : memref<128x1xf32, #tpu.memory_space<vmem>>, vector<128x1xf32>
      %47 = arith.mulf %41, %40 : vector<128x1xf32>
      %48 = arith.subf %46, %47 : vector<128x1xf32>
      %cst_29 = arith.constant -1.000000e+00 : f32
      %49 = vector.broadcast %cst_29 : f32 to vector<128x1xf32>
      %50 = arith.mulf %49, %48 : vector<128x1xf32>
      %51 = arith.divf %50, %45 : vector<128x1xf32>
      %c0_30 = arith.constant 0 : index
      %c0_31 = arith.constant 0 : index
      %52 = vector.load %arg7[%c0_30, %c0_31] : memref<128x1xf32, #tpu.memory_space<vmem>>, vector<128x1xf32>
      tpu.vector_store %arg7[%c0_30, %c0_31], %51 {strides = array<i32>} : memref<128x1xf32, #tpu.memory_space<vmem>>, vector<128x1xf32>,
    } else {
    }
    return
  }
  func.func @transform_0(%arg0: i32, %arg1: i32) -> (i32, i32) {
    %c0_i32 = arith.constant 0 : i32
    %c0_i32_0 = arith.constant 0 : i32
    return %arg0, %c0_i32 : i32, i32
  }
  func.func @transform_1(%arg0: i32, %arg1: i32) -> (i32, i32) {
    %c0_i32 = arith.constant 0 : i32
    %c0_i32_0 = arith.constant 0 : i32
    return %c0_i32, %arg1 : i32, i32
  }
  func.func @transform_2(%arg0: i32, %arg1: i32) -> (i32, i32) {
    %c0_i32 = arith.constant 0 : i32
    %c0_i32_0 = arith.constant 0 : i32
    return %arg0, %c0_i32 : i32, i32
  }
  func.func @transform_3(%arg0: i32, %arg1: i32) -> (i32, i32) {
    %c0_i32 = arith.constant 0 : i32
    %c0_i32_0 = arith.constant 0 : i32
    return %arg0, %c0_i32 : i32, i32
  }
  func.func @transform_4(%arg0: i32, %arg1: i32) -> (i32, i32) {
    %c0_i32 = arith.constant 0 : i32
    %c0_i32_0 = arith.constant 0 : i32
    return %arg1, %c0_i32 : i32, i32
  }
  func.func @transform_5(%arg0: i32, %arg1: i32) -> (i32, i32) {
    %c0_i32 = arith.constant 0 : i32
    %c0_i32_0 = arith.constant 0 : i32
    return %arg0, %c0_i32 : i32, i32
  }
}

</mosaic_0001>

<bundles_post_ra>
// kernel: tpu_custom_call.1
= control target key start
LH: loop header
LB: loop body
LE: loop exit
PB: predicated region body
PF: predicated region fallthrough
CT: control target
= control target key end

     0   :  { %vm105_vm0 = vcmask 261120   ;;  %v1823_v3 = vmov 0   ;;  %vm24_vm2 = vcmask 7168   ;;  %s2985_s4 = inlined_call_operand.vmem [shape: f32[128,32], index: 4, kind: input, shape index: {}]   ;;  %s2986_s3 = inlined_call_operand.vmem [shape: f32[128,32], index: 3, kind: input, shape index: {}]   ;;  %s2987_s0 = inlined_call_operand.vmem [shape: s32[128,1], index: 0, kind: input, shape index: {}]   ;;  %s2988_s1 = inlined_call_operand.vmem [shape: s32[1,128], index: 1, kind: input, shape index: {}]   ;;  %s2989_s2 = inlined_call_operand.vmem [shape: f32[128,1], index: 2, kind: input, shape index: {}]   ;;  %s2990_s5 = inlined_call_operand.vmem [shape: f32[128,1], index: 5, kind: output, shape index: {}]  }
   0x1   :  { %v138_v0 = vld [vmem:[%s2985_s4] sm:$0xff]  ;;  %v139_v1 = vld [vmem:[%s2985_s4 + $0x8] sm:$0xff]  ;;  %vm1864_vm1 = vmpackc.low %vm105_vm0, %vm105_vm0  ;;  %1694 = vset.pattern.permute.xlu0 %v1823_v3  ;;  %1693 = vset.pattern.permute.xlu1 %v1823_v3 }
   0x2   :  { %v1626_v4 = vpack.c.bf16 %v139_v1, %v138_v0  ;;  %v140_v5 = vld [vmem:[%s2985_s4 + $0x10] sm:$0xff]  ;;  %v141_v6 = vld [vmem:[%s2985_s4 + $0x18] sm:$0xff]  ;;  %v142_v8 = vld [vmem:[%s2985_s4 + $0x20] sm:$0xff] }
   0x3   :  { %v1632_v7 = vpack.c.bf16 %v141_v6, %v140_v5  ;;  %v143_v9 = vld [vmem:[%s2985_s4 + $0x28] sm:$0xff]  ;;  %v73_v10 = vld [vmem:[%s2986_s3] sm:$0xff]  ;;  %v75_v18 = vld [vmem:[%s2986_s3 + $0x10] sm:$0xff] }
   0x4   :  { %1628 = vmatprep.subr.msk.bf16.mxu0 %vm1864_vm1, %v1626_v4  ;;  %1674 = vmatprep.subr.msk.bf16.mxu1 %vm1864_vm1, %v1626_v4  ;;  %v89_v11 = vmul.f32 14.285714, %v73_v10  ;;  %v81_v12 = vld [vmem:[%s2986_s3 + $0x40] sm:$0xff]  ;;  %v74_v13 = vld [vmem:[%s2986_s3 + $0x8] sm:$0xff]  ;;  %v76_v19 = vld [vmem:[%s2986_s3 + $0x18] sm:$0xff]  ;;  %v1638_v21 = vpack.c.bf16 %v143_v9, %v142_v8 }
   0x5   :  { %1631 = vmatpush3.bf16.xpose.msk.msra.mxu0 %vm1864_vm1, %v1626_v4  ;;  %1682 = vmatpush3.bf16.xpose.msk.msra.mxu1 %vm1864_vm1, %v1626_v4  ;;  %v82_v14 = vld [vmem:[%s2986_s3 + $0x48] sm:$0xff]  ;;  %v97_v15 = vmul.f32 14.285714, %v81_v12  ;;  %v90_v16 = vmul.f32 14.285714, %v74_v13  ;;  %v83_v20 = vld [vmem:[%s2986_s3 + $0x50] sm:$0xff] }
   0x6   :  { %1634 = vmatprep.subr.msk.bf16.mxu0 %vm1864_vm1, %v1632_v7  ;;  %1675 = vmatprep.subr.msk.bf16.mxu1 %vm1864_vm1, %v1632_v7  ;;  %v98_v17 = vmul.f32 14.285714, %v82_v14  ;;  %106 = vst.msk [vmem:[#allocation5] sm:$0xff] %vm105_vm0, %v89_v11  ;;  %v91_v22 = vmul.f32 14.285714, %v75_v18  ;;  %v84_v25 = vld [vmem:[%s2986_s3 + $0x58] sm:$0xff] }
   0x7   :  { %114 = vst.msk [vmem:[#allocation5 + $0x40] sm:$0xff] %vm105_vm0, %v97_v15  ;;  %107 = vst.msk [vmem:[#allocation5 + $0x8] sm:$0xff] %vm105_vm0, %v90_v16  ;;  %v92_v23 = vmul.f32 14.285714, %v76_v19  ;;  %v99_v24 = vmul.f32 14.285714, %v83_v20  ;;  %v733_v15 = vlaneseq }
   0x8   :  { %115 = vst.msk [vmem:[#allocation5 + $0x48] sm:$0xff] %vm105_vm0, %v98_v17  ;;  %v77_v26 = vld [vmem:[%s2986_s3 + $0x20] sm:$0xff]  ;;  %v78_v27 = vld [vmem:[%s2986_s3 + $0x28] sm:$0xff]  ;;  %108 = vst.msk [vmem:[#allocation5 + $0x10] sm:$0xff] %vm105_vm0, %v91_v22  ;;  %v100_v28 = vmul.f32 14.285714, %v84_v25 }
   0x9   :  { %109 = vst.msk [vmem:[#allocation5 + $0x18] sm:$0xff] %vm105_vm0, %v92_v23  ;;  %116 = vst.msk [vmem:[#allocation5 + $0x50] sm:$0xff] %vm105_vm0, %v99_v24  ;;  %v93_v29 = vmul.f32 14.285714, %v77_v26  ;;  %v94_v30 = vmul.f32 14.285714, %v78_v27 }
   0xa   :  { %v144_v31 = vld [vmem:[%s2985_s4 + $0x30] sm:$0xff]  ;;  %v145_v32 = vld [vmem:[%s2985_s4 + $0x38] sm:$0xff]  ;;  %v85_v33 = vld [vmem:[%s2986_s3 + $0x60] sm:$0xff]  ;;  %117 = vst.msk [vmem:[#allocation5 + $0x58] sm:$0xff] %vm105_vm0, %v100_v28  ;;  %v1824_v14 = vmov -inf   ;;  %v2082_v16 = vshrl.u32 %v733_v15, 7 }
   0xb   :  { %v86_v34 = vld [vmem:[%s2986_s3 + $0x68] sm:$0xff]  ;;  %v79_v35 = vld [vmem:[%s2986_s3 + $0x30] sm:$0xff]  ;;  %110 = vst.msk [vmem:[#allocation5 + $0x20] sm:$0xff] %vm105_vm0, %v93_v29  ;;  %111 = vst.msk [vmem:[#allocation5 + $0x28] sm:$0xff] %vm105_vm0, %v94_v30  ;;  %v101_v36 = vmul.f32 14.285714, %v85_v33  ;;  %v1644_v48 = vpack.c.bf16 %v145_v32, %v144_v31 }
   0xc   :  { %v102_v37 = vmul.f32 14.285714, %v86_v34  ;;  %v95_v38 = vmul.f32 14.285714, %v79_v35  ;;  %v80_v39 = vld [vmem:[%s2986_s3 + $0x38] sm:$0xff]  ;;  %v87_v40 = vld [vmem:[%s2986_s3 + $0x70] sm:$0xff] }
   0xd   :  { %1637 = vmatpush3.bf16.xpose.msk.msra.mxu0 %vm1864_vm1, %v1632_v7  ;;  %1683 = vmatpush3.bf16.xpose.msk.msra.mxu1 %vm1864_vm1, %v1632_v7  ;;  %v88_v41 = vld [vmem:[%s2986_s3 + $0x78] sm:$0xff]  ;;  %v122_v42 = vld [vmem:[#allocation5] sm:$0xff]  ;;  %118 = vst.msk [vmem:[#allocation5 + $0x60] sm:$0xff] %vm105_vm0, %v101_v36  ;;  %v96_v43 = vmul.f32 14.285714, %v80_v39  ;;  %v637_v45 = vld [vmem:[%s2987_s0 + $0x8] sm:$0xff] }
   0xe   :  { %1640 = vmatprep.subr.msk.bf16.mxu0 %vm1864_vm1, %v1638_v21  ;;  %1676 = vmatprep.subr.msk.bf16.mxu1 %vm1864_vm1, %v1638_v21  ;;  %119 = vst.msk [vmem:[#allocation5 + $0x68] sm:$0xff] %vm105_vm0, %v102_v37  ;;  %112 = vst.msk [vmem:[#allocation5 + $0x30] sm:$0xff] %vm105_vm0, %v95_v38  ;;  %v103_v44 = vmul.f32 14.285714, %v87_v40  ;;  %v130_v46 = vld [vmem:[#allocation5 + $0x40] sm:$0xff]  ;;  %v639_v50 = vld [vmem:[%s2987_s0 + $0x18] sm:$0xff] }
   0xf   :  { %1602 = vmatprep.mubr.msk.f32.mxu0 %vm105_vm0, %v122_v42  ;;  %v104_v47 = vmul.f32 14.285714, %v88_v41  ;;  %657 = vperm.xlu0 %1694, %v637_v45   ;;  %113 = vst.msk [vmem:[#allocation5 + $0x38] sm:$0xff] %vm105_vm0, %v96_v43  ;;  %v636_v49 = vld [vmem:[%s2987_s0] sm:$0xff]  ;;  %v638_v51 = vld [vmem:[%s2987_s0 + $0x10] sm:$0xff]  ;;  %v147_v53 = vld [vmem:[%s2985_s4 + $0x48] sm:$0xff] }
  0x10   :  { %1614 = vmatprep.mubr.msk.f32.mxu1 %vm105_vm0, %v130_v46  ;;  %120 = vst.msk [vmem:[#allocation5 + $0x70] sm:$0xff] %vm105_vm0, %v103_v44  ;;  %654 = vperm.xlu1 %1693, %v636_v49   ;;  %v146_v52 = vld [vmem:[%s2985_s4 + $0x40] sm:$0xff]  ;;  %v148_v55 = vld [vmem:[%s2985_s4 + $0x50] sm:$0xff]  ;;  %v149_v56 = vld [vmem:[%s2985_s4 + $0x58] sm:$0xff]  ;;  %v2084_v17 = vand.u32 127, %v733_v15  ;;  %v735_v18 = vadd.s32 8, %v2082_v16 }
  0x11   :  { %121 = vst.msk [vmem:[#allocation5 + $0x78] sm:$0xff] %vm105_vm0, %v104_v47  ;;  %v1650_v54 = vpack.c.bf16 %v147_v53, %v146_v52  ;;  %v1656_v57 = vpack.c.bf16 %v149_v56, %v148_v55  ;;  %v150_v58 = vld [vmem:[%s2985_s4 + $0x60] sm:$0xff]  ;;  %v151_v59 = vld [vmem:[%s2985_s4 + $0x68] sm:$0xff]  ;;  %v152_v61 = vld [vmem:[%s2985_s4 + $0x70] sm:$0xff]  ;;  %v1825_v44 = vmov 0.0   ;;  %v747_v25 = vadd.s32 104, %v2082_v16 }
  0x12   :  { %v1662_v60 = vpack.c.bf16 %v151_v59, %v150_v58  ;;  %v153_v62 = vld [vmem:[%s2985_s4 + $0x78] sm:$0xff]  ;;  %v123_v0 = vld [vmem:[#allocation5 + $0x8] sm:$0xff]  ;;  %v124_v3 = vld [vmem:[#allocation5 + $0x10] sm:$0xff]  ;;  %26 = vst.msk [vmem:[#allocation2 + $0x8] sm:$0xff] %vm24_vm2, %v1824_v14  ;;  %vm787_vm3 = vcmp.lt.s32.totalorder %v2084_v17, 8  ;;  %vm772_vm4 = vcmp.ne.s32.totalorder %v735_v18, %v2084_v17  ;;  %vm771_vm5 = vcmp.ne.s32.totalorder %v2082_v16, %v2084_v17 }
  0x13   :  { %663 = vperm.xlu0 %1694, %v639_v50   ;;  %v1668_v63 = vpack.c.bf16 %v153_v62, %v152_v61  ;;  %v131_v1 = vld [vmem:[#allocation5 + $0x48] sm:$0xff]  ;;  %v132_v4 = vld [vmem:[#allocation5 + $0x50] sm:$0xff]  ;;  %v125_v5 = vld [vmem:[#allocation5 + $0x18] sm:$0xff]  ;;  %25 = vst.msk [vmem:[#allocation2] sm:$0xff] %vm24_vm2, %v1824_v14  ;;  %v744_v22 = vadd.s32 80, %v2082_v16 }
  0x14   :  { %660 = vperm.xlu1 %1693, %v638_v51   ;;  %v133_v6 = vld [vmem:[#allocation5 + $0x58] sm:$0xff]  ;;  %v126_v7 = vld [vmem:[#allocation5 + $0x20] sm:$0xff]  ;;  %v127_v2 = vld [vmem:[#allocation5 + $0x28] sm:$0xff]  ;;  %27 = vst.msk [vmem:[#allocation2 + $0x10] sm:$0xff] %vm24_vm2, %v1824_v14 }
  0x15   :  { %1643 = vmatpush3.bf16.xpose.msk.msra.mxu0 %vm1864_vm1, %v1638_v21  ;;  %1684 = vmatpush3.bf16.xpose.msk.msra.mxu1 %vm1864_vm1, %v1638_v21  ;;  %v134_v8 = vld [vmem:[#allocation5 + $0x60] sm:$0xff]  ;;  %v135_v9 = vld [vmem:[#allocation5 + $0x68] sm:$0xff]  ;;  %v128_v10 = vld [vmem:[#allocation5 + $0x30] sm:$0xff]  ;;  %28 = vst.msk [vmem:[#allocation2 + $0x18] sm:$0xff] %vm24_vm2, %v1824_v14 }
  0x16   :  { %1646 = vmatprep.subr.msk.bf16.mxu0 %vm1864_vm1, %v1644_v48  ;;  %1677 = vmatprep.subr.msk.bf16.mxu1 %vm1864_vm1, %v1644_v48  ;;  %v129_v12 = vld [vmem:[#allocation5 + $0x38] sm:$0xff]  ;;  %29 = vst.msk [vmem:[#allocation2 + $0x20] sm:$0xff] %vm24_vm2, %v1824_v14  ;;  %30 = vst.msk [vmem:[#allocation2 + $0x28] sm:$0xff] %vm24_vm2, %v1824_v14  ;;  %v2090_v19 = vld [vmem:[%s2988_s1] ss:$0 sm:$0xff] }
  0x17   :  { %v136_v11 = vld [vmem:[#allocation5 + $0x70] sm:$0xff]  ;;  %31 = vst.msk [vmem:[#allocation2 + $0x30] sm:$0xff] %vm24_vm2, %v1824_v14  ;;  %32 = vst.msk [vmem:[#allocation2 + $0x38] sm:$0xff] %vm24_vm2, %v1824_v14  ;;  %v651_v56 = vld [vmem:[%s2987_s0 + $0x78] sm:$0xff] }
  0x18   :  { %v137_v13 = vld [vmem:[#allocation5 + $0x78] sm:$0xff]  ;;  %33 = vst.msk [vmem:[#allocation2 + $0x40] sm:$0xff] %vm24_vm2, %v1824_v14  ;;  %34 = vst.msk [vmem:[#allocation2 + $0x48] sm:$0xff] %vm24_vm2, %v1824_v14 }
  0x19   :  { %35 = vst.msk [vmem:[#allocation2 + $0x50] sm:$0xff] %vm24_vm2, %v1824_v14  ;;  %36 = vst.msk [vmem:[#allocation2 + $0x58] sm:$0xff] %vm24_vm2, %v1824_v14  ;;  %v2212_v47 = vld [vmem:[#allocation2 + $0x8] sm:$0xff] }
  0x1a   :  { %37 = vst.msk [vmem:[#allocation2 + $0x60] sm:$0xff] %vm24_vm2, %v1824_v14  ;;  %38 = vst.msk [vmem:[#allocation2 + $0x68] sm:$0xff] %vm24_vm2, %v1824_v14  ;;  %v2222_v53 = vld [vmem:[#allocation2] sm:$0xff] }
  0x1b   :  { %39 = vst.msk [vmem:[#allocation2 + $0x70] sm:$0xff] %vm24_vm2, %v1824_v14  ;;  %40 = vst.msk [vmem:[#allocation2 + $0x78] sm:$0xff] %vm24_vm2, %v1824_v14 }
  0x1c   :  { %vm2099_vm7 = vmand %vm772_vm4, %vm787_vm3  ;;  %57 = vst.msk [vmem:[#allocation4] sm:$0xff] %vm24_vm2, %v1825_v44 }
  0x1d   :  { %1649 = vmatpush3.bf16.xpose.msk.msra.mxu0 %vm1864_vm1, %v1644_v48  ;;  %1685 = vmatpush3.bf16.xpose.msk.msra.mxu1 %vm1864_vm1, %v1644_v48  ;;  %vm2106_vm9 = vmand %vm771_vm5, %vm787_vm3  ;;  %41 = vst.msk [vmem:[#allocation3] sm:$0xff] %vm24_vm2, %v1825_v44  ;;  %v2283_v14 = vld [vmem:[#allocation2 + $0x20] sm:$0xff] }
  0x1e   :  { %1652 = vmatprep.subr.msk.bf16.mxu0 %vm1864_vm1, %v1650_v54  ;;  %1678 = vmatprep.subr.msk.bf16.mxu1 %vm1864_vm1, %v1650_v54  ;;  %42 = vst.msk [vmem:[#allocation3 + $0x8] sm:$0xff] %vm24_vm2, %v1825_v44  ;;  %43 = vst.msk [vmem:[#allocation3 + $0x10] sm:$0xff] %vm24_vm2, %v1825_v44  ;;  %v2321_v15 = vld [vmem:[#allocation2 + $0x30] sm:$0xff] }
  0x1f   :  { %44 = vst.msk [vmem:[#allocation3 + $0x18] sm:$0xff] %vm24_vm2, %v1825_v44  ;;  %45 = vst.msk [vmem:[#allocation3 + $0x20] sm:$0xff] %vm24_vm2, %v1825_v44  ;;  %v2214_v48 = vld [vmem:[#allocation2 + $0x48] sm:$0xff]  ;;  %v2242_v61 = vld [vmem:[#allocation2 + $0x40] sm:$0xff] }
  0x20   :  { %46 = vst.msk [vmem:[#allocation3 + $0x28] sm:$0xff] %vm24_vm2, %v1825_v44  ;;  %47 = vst.msk [vmem:[#allocation3 + $0x30] sm:$0xff] %vm24_vm2, %v1825_v44  ;;  %v2244_v62 = vld [vmem:[#allocation2 + $0x58] sm:$0xff] }
  0x21   :  { %48 = vst.msk [vmem:[#allocation3 + $0x38] sm:$0xff] %vm24_vm2, %v1825_v44  ;;  %49 = vst.msk [vmem:[#allocation3 + $0x40] sm:$0xff] %vm24_vm2, %v1825_v44 }
  0x22   :  { %50 = vst.msk [vmem:[#allocation3 + $0x48] sm:$0xff] %vm24_vm2, %v1825_v44  ;;  %51 = vst.msk [vmem:[#allocation3 + $0x50] sm:$0xff] %vm24_vm2, %v1825_v44  ;;  %v2341_v55 = vld [vmem:[#allocation2 + $0x70] sm:$0xff] }
  0x23   :  { %52 = vst.msk [vmem:[#allocation3 + $0x58] sm:$0xff] %vm24_vm2, %v1825_v44  ;;  %53 = vst.msk [vmem:[#allocation3 + $0x60] sm:$0xff] %vm24_vm2, %v1825_v44 }
  0x24   :  { %54 = vst.msk [vmem:[#allocation3 + $0x68] sm:$0xff] %vm24_vm2, %v1825_v44  ;;  %55 = vst.msk [vmem:[#allocation3 + $0x70] sm:$0xff] %vm24_vm2, %v1825_v44 }
  0x25   :  { %1655 = vmatpush3.bf16.xpose.msk.msra.mxu0 %vm1864_vm1, %v1650_v54  ;;  %1686 = vmatpush3.bf16.xpose.msk.msra.mxu1 %vm1864_vm1, %v1650_v54  ;;  %56 = vst.msk [vmem:[#allocation3 + $0x78] sm:$0xff] %vm24_vm2, %v1825_v44  ;;  %58 = vst.msk [vmem:[#allocation4 + $0x8] sm:$0xff] %vm24_vm2, %v1825_v44  ;;  %v2224_v54 = vld [vmem:[#allocation2 + $0x18] sm:$0xff] }
  0x26   :  { %1658 = vmatprep.subr.msk.bf16.mxu0 %vm1864_vm1, %v1656_v57  ;;  %1679 = vmatprep.subr.msk.bf16.mxu1 %vm1864_vm1, %v1656_v57  ;;  %59 = vst.msk [vmem:[#allocation4 + $0x10] sm:$0xff] %vm24_vm2, %v1825_v44  ;;  %60 = vst.msk [vmem:[#allocation4 + $0x18] sm:$0xff] %vm24_vm2, %v1825_v44 }
  0x27   :  { %61 = vst.msk [vmem:[#allocation4 + $0x20] sm:$0xff] %vm24_vm2, %v1825_v44  ;;  %62 = vst.msk [vmem:[#allocation4 + $0x28] sm:$0xff] %vm24_vm2, %v1825_v44 }
  0x28   :  { %63 = vst.msk [vmem:[#allocation4 + $0x30] sm:$0xff] %vm24_vm2, %v1825_v44  ;;  %64 = vst.msk [vmem:[#allocation4 + $0x38] sm:$0xff] %vm24_vm2, %v1825_v44 }
  0x29   :  { %65 = vst.msk [vmem:[#allocation4 + $0x40] sm:$0xff] %vm24_vm2, %v1825_v44  ;;  %66 = vst.msk [vmem:[#allocation4 + $0x48] sm:$0xff] %vm24_vm2, %v1825_v44 }
  0x2a   :  { %67 = vst.msk [vmem:[#allocation4 + $0x50] sm:$0xff] %vm24_vm2, %v1825_v44  ;;  %68 = vst.msk [vmem:[#allocation4 + $0x58] sm:$0xff] %vm24_vm2, %v1825_v44 }
  0x2b   :  { %69 = vst.msk [vmem:[#allocation4 + $0x60] sm:$0xff] %vm24_vm2, %v1825_v44  ;;  %70 = vst.msk [vmem:[#allocation4 + $0x68] sm:$0xff] %vm24_vm2, %v1825_v44 }
  0x2c   :  { %71 = vst.msk [vmem:[#allocation4 + $0x70] sm:$0xff] %vm24_vm2, %v1825_v44  ;;  %72 = vst.msk [vmem:[#allocation4 + $0x78] sm:$0xff] %vm24_vm2, %v1825_v44 }
  0x2d   :  { %1661 = vmatpush3.bf16.xpose.msk.msra.mxu0 %vm1864_vm1, %v1656_v57  ;;  %1687 = vmatpush3.bf16.xpose.msk.msra.mxu1 %vm1864_vm1, %v1656_v57  ;;  %3013 = vst [vmem:[#allocation7_spill] sm:$0xff] %v2283_v14  ;;  %3017 = vst [vmem:[#allocation11_spill] sm:$0xff] %v2321_v15 }
  0x2e   :  { %1664 = vmatprep.subr.msk.bf16.mxu0 %vm1864_vm1, %v1662_v60  ;;  %1680 = vmatprep.subr.msk.bf16.mxu1 %vm1864_vm1, %v1662_v60  ;;  %3020 = vst [vmem:[#allocation14_spill] sm:$0xff] %v2341_v55 }
  0x35   :  { %1667 = vmatpush3.bf16.xpose.msk.msra.mxu0 %vm1864_vm1, %v1662_v60  ;;  %1688 = vmatpush3.bf16.xpose.msk.msra.mxu1 %vm1864_vm1, %v1662_v60 }
  0x36   :  { %1670 = vmatprep.subr.msk.bf16.mxu0 %vm1864_vm1, %v1668_v63  ;;  %1681 = vmatprep.subr.msk.bf16.mxu1 %vm1864_vm1, %v1668_v63 }
  0x3d   :  { %1673 = vmatpush3.bf16.xpose.msk.msra.mxu0 %vm1864_vm1, %v1668_v63  ;;  %1689 = vmatpush3.bf16.xpose.msk.msra.mxu1 %vm1864_vm1, %v1668_v63 }
  0x44   :  { %1603 = vmatmul.mubr.msk.f32.vlgmr.msra.gmra.mrb[0].mxu0 %vm105_vm0, %v123_v0  ;;  %1615 = vmatmul.mubr.msk.f32.vlgmr.msra.gmra.mrb[0].mxu1 %vm105_vm0, %v131_v1 }
  0x45   :  { %1605 = vmatprep.mubr.msk.f32.mxu0 %vm105_vm0, %v124_v3  ;;  %1617 = vmatprep.mubr.msk.f32.mxu1 %vm105_vm0, %v132_v4 }
  0x48   :  { %1606 = vmatmul.mubr.msk.f32.gmra.mrb[2].mxu0 %vm105_vm0, %v125_v5  ;;  %1618 = vmatmul.mubr.msk.f32.gmra.mrb[2].mxu1 %vm105_vm0, %v133_v6  ;;  %v2261_v6 = vld [vmem:[#allocation2 + $0x50] sm:$0xff] }
  0x49   :  { %1608 = vmatprep.mubr.msk.f32.mxu0 %vm105_vm0, %v126_v7  ;;  %1620 = vmatprep.mubr.msk.f32.mxu1 %vm105_vm0, %v134_v8  ;;  %v2263_v7 = vld [vmem:[#allocation2 + $0x10] sm:$0xff] }
  0x4c   :  { %1609 = vmatmul.mubr.msk.f32.gmra.mrb[4].mxu0 %vm105_vm0, %v127_v2  ;;  %1621 = vmatmul.mubr.msk.f32.gmra.mrb[4].mxu1 %vm105_vm0, %v135_v9  ;;  %v647_v2 = vld [vmem:[%s2987_s0 + $0x58] sm:$0xff] }
  0x4d   :  { %1611 = vmatprep.mubr.msk.f32.mxu0 %vm105_vm0, %v128_v10  ;;  %1623 = vmatprep.mubr.msk.f32.mxu1 %vm105_vm0, %v136_v11 }
  0x50   :  { %1612 = vmatmul.mubr.msk.f32.gmra.mrb[6].mxu0 %vm105_vm0, %v129_v12  ;;  %1624 = vmatmul.mubr.msk.f32.gmra.mrb[6].mxu1 %vm105_vm0, %v137_v13  ;;  %v2281_v13 = vld [vmem:[#allocation2 + $0x28] sm:$0xff] }
  0x8e   :  { %v658_v20 = vpop.permute.xlu0 %657 }
  0x8f   :  { %v655_v21 = vpop.permute.xlu1 %654  ;;  %vm706_vm6 = vcmp.eq.s32.totalorder %v658_v20, %v2090_v19 }
  0x90   :  { %vm705_vm8 = vcmp.eq.s32.totalorder %v655_v21, %v2090_v19  ;;  %vm2112_vm10 = vmand %vm706_vm6, %vm2099_vm7 }
  0x91   :  { %vm2118_vm11 = vmand %vm705_vm8, %vm2106_vm9 }
  0x92   :  { %v2208_v45 = vpop.permute.xlu0 %663 }
  0x93   :  { %v2210_v46 = vpop.permute.xlu1 %660  ;;  %vm708_vm1 = vcmp.eq.s32.totalorder %v2208_v45, %v2090_v19 }
  0x94   :  { %vm707_vm13 = vcmp.eq.s32.totalorder %v2210_v46, %v2090_v19 }
 0x117   :  { %v2122_v26 = vpop.f32.mrb[0].mxu0  ;;  %v2124_v27 = vpop.f32.mrb[0].mxu1 }
 0x118   :  { %v2126_v28 = vpop.f32.mrb[1].mxu0  ;;  %414 = vmax.xlane.f32.xlu0 %v2122_v26  ;;  %430 = vmax.xlane.f32.xlu1 %v2124_v27  ;;  %v2130_v29 = vpop.f32.mrb[1].mxu1  ;;  %v869_v30 = vsel %vm2112_vm10, %v2122_v26, 0.0 }
 0x119   :  { %v868_v31 = vsel %vm2118_vm11, %v2126_v28, 0.0 }
 0x11b   :  { %v2138_v32 = vpop.f32.mrb[2].mxu0  ;;  %v2140_v33 = vpop.f32.mrb[2].mxu1 }
 0x11c   :  { %412 = vmax.xlane.f32.xlu0 %v2126_v28  ;;  %418 = vmax.xlane.f32.xlu1 %v2138_v32  ;;  %v2144_v34 = vpop.f32.mrb[3].mxu0  ;;  %v2146_v35 = vpop.f32.mrb[3].mxu1 }
 0x11f   :  { %v2148_v36 = vpop.f32.mrb[4].mxu0  ;;  %v2150_v37 = vpop.f32.mrb[4].mxu1 }
 0x120   :  { %428 = vmax.xlane.f32.xlu0 %v2130_v29  ;;  %434 = vmax.xlane.f32.xlu1 %v2140_v33  ;;  %v2154_v38 = vpop.f32.mrb[5].mxu0  ;;  %v2156_v39 = vpop.f32.mrb[5].mxu1 }
 0x123   :  { %v2158_v40 = vpop.f32.mrb[6].mxu0  ;;  %v2160_v41 = vpop.f32.mrb[6].mxu1 }
 0x124   :  { %432 = vmax.xlane.f32.xlu0 %v2146_v35  ;;  %416 = vmax.xlane.f32.xlu1 %v2144_v34  ;;  %v2164_v42 = vpop.f32.mrb[7].mxu0  ;;  %v2166_v43 = vpop.f32.mrb[7].mxu1 }
 0x128   :  { %422 = vmax.xlane.f32.xlu1 %v2148_v36  ;;  %420 = vmax.xlane.f32.xlu0 %v2154_v38 }
 0x12c   :  { %438 = vmax.xlane.f32.xlu1 %v2150_v37  ;;  %436 = vmax.xlane.f32.xlu0 %v2156_v39 }
 0x130   :  { %426 = vmax.xlane.f32.xlu1 %v2158_v40  ;;  %424 = vmax.xlane.f32.xlu0 %v2164_v42 }
 0x134   :  { %442 = vmax.xlane.f32.xlu1 %v2160_v41  ;;  %440 = vmax.xlane.f32.xlu0 %v2166_v43 }
 0x1a5   :  { %v415_v49 = vpop.xlane.xlu0 %414  ;;  %v431_v50 = vpop.xlane.xlu1 %430 }
 0x1a6   :  { %v2217_v51 = vmax.f32 %v2212_v47, %v415_v49  ;;  %v2220_v52 = vmax.f32 %v2214_v48, %v431_v50  ;;  %v2300_v50 = vld [vmem:[#allocation2 + $0x68] sm:$0xff] }
 0x1a8   :  { %1030 = vst.msk [vmem:[#allocation2 + $0x8] sm:$0xff] %vm24_vm2, %v2217_v51  ;;  %1038 = vst.msk [vmem:[#allocation2 + $0x48] sm:$0xff] %vm24_vm2, %v2220_v52  ;;  %515 = vperm.xlu1 %1693, %v2217_v51   ;;  %555 = vperm.xlu0 %1694, %v2220_v52  }
 0x1a9   :  { %v413_v57 = vpop.xlane.xlu0 %412  ;;  %v419_v58 = vpop.xlane.xlu1 %418 }
 0x1aa   :  { %v2237_v59 = vmax.f32 %v2222_v53, %v413_v57  ;;  %v2240_v60 = vmax.f32 %v2224_v54, %v419_v58  ;;  %v2302_v57 = vld [vmem:[#allocation2 + $0x60] sm:$0xff]  ;;  %v2339_v58 = vld [vmem:[#allocation2 + $0x78] sm:$0xff] }
 0x1ab   :  { %3015 = vst [vmem:[#allocation9_spill] sm:$0xff] %v2302_v57  ;;  %3019 = vst [vmem:[#allocation13_spill] sm:$0xff] %v2339_v58 }
 0x1ac   :  { %1029 = vst.msk [vmem:[#allocation2] sm:$0xff] %vm24_vm2, %v2237_v59  ;;  %1032 = vst.msk [vmem:[#allocation2 + $0x18] sm:$0xff] %vm24_vm2, %v2240_v60  ;;  %510 = vperm.xlu0 %1694, %v2237_v59  }
 0x1ad   :  { %v429_v1 = vpop.xlane.xlu0 %428  ;;  %v435_v3 = vpop.xlane.xlu1 %434 }
 0x1ae   :  { %v2256_v4 = vmax.f32 %v2242_v61, %v429_v1  ;;  %v2259_v5 = vmax.f32 %v2244_v62, %v435_v3 }
 0x1b0   :  { %1037 = vst.msk [vmem:[#allocation2 + $0x40] sm:$0xff] %vm24_vm2, %v2256_v4  ;;  %1040 = vst.msk [vmem:[#allocation2 + $0x58] sm:$0xff] %vm24_vm2, %v2259_v5  ;;  %550 = vperm.xlu1 %1693, %v2256_v4   ;;  %565 = vperm.xlu0 %1694, %v2259_v5  }
 0x1b1   :  { %v433_v9 = vpop.xlane.xlu0 %432  ;;  %v417_v10 = vpop.xlane.xlu1 %416 }
 0x1b2   :  { %v2276_v11 = vmax.f32 %v2261_v6, %v433_v9  ;;  %v2279_v12 = vmax.f32 %v2263_v7, %v417_v10 }
 0x1b4   :  { %3012 = vst [vmem:[#allocation6_spill] sm:$0xff] %v2276_v11  ;;  %1039 = vst.msk [vmem:[#allocation2 + $0x50] sm:$0xff] %vm24_vm2, %v2276_v11  ;;  %525 = vperm.xlu1 %1693, %v2240_v60  }
 0x1b5   :  { %1031 = vst.msk [vmem:[#allocation2 + $0x10] sm:$0xff] %vm24_vm2, %v2279_v12  ;;  %v423_v20 = vpop.xlane.xlu1 %422  ;;  %v421_v21 = vpop.xlane.xlu0 %420 }
 0x1b6   :  { %v2295_v44 = vmax.f32 %v2281_v13, %v423_v20  ;;  %v2298_v49 = vmax.f32 %v2283_v14, %v421_v21  ;;  %v2319_v21 = vld [vmem:[#allocation2 + $0x38] sm:$0xff] }
 0x1b8   :  { %3014 = vst [vmem:[#allocation8_spill] sm:$0xff] %v2298_v49  ;;  %1034 = vst.msk [vmem:[#allocation2 + $0x28] sm:$0xff] %vm24_vm2, %v2295_v44  ;;  %520 = vperm.xlu1 %1693, %v2279_v12  }
 0x1b9   :  { %1033 = vst.msk [vmem:[#allocation2 + $0x20] sm:$0xff] %vm24_vm2, %v2298_v49  ;;  %v439_v3 = vpop.xlane.xlu1 %438  ;;  %v437_v9 = vpop.xlane.xlu0 %436 }
 0x1ba   :  { %v2314_v10 = vmax.f32 %v2300_v50, %v439_v3  ;;  %v2317_v20 = vmax.f32 %v2302_v57, %v437_v9  ;;  %v645_v3 = vld [vmem:[%s2987_s0 + $0x48] sm:$0xff]  ;;  %v739_v57 = vadd.s32 40, %v2082_v16 }
 0x1bc   :  { %3016 = vst [vmem:[#allocation10_spill] sm:$0xff] %v2317_v20  ;;  %1042 = vst.msk [vmem:[#allocation2 + $0x68] sm:$0xff] %vm24_vm2, %v2314_v10  ;;  %560 = vperm.xlu1 %1693, %v2276_v11   ;;  %575 = vperm.xlu0 %1694, %v2314_v10   ;;  %vm776_vm6 = vcmp.ne.s32.totalorder %v739_v57, %v2084_v17  ;;  %v745_v11 = vadd.s32 88, %v2082_v16 }
 0x1bd   :  { %1041 = vst.msk [vmem:[#allocation2 + $0x60] sm:$0xff] %vm24_vm2, %v2317_v20  ;;  %v427_v9 = vpop.xlane.xlu1 %426  ;;  %v425_v1 = vpop.xlane.xlu0 %424  ;;  %vm2455_vm8 = vmand %vm776_vm6, %vm787_vm3 }
 0x1be   :  { %v2334_v8 = vmax.f32 %v2319_v21, %v427_v9  ;;  %v2337_v18 = vmax.f32 %v2321_v15, %v425_v1 }
 0x1c0   :  { %3018 = vst [vmem:[#allocation12_spill] sm:$0xff] %v2337_v18  ;;  %1036 = vst.msk [vmem:[#allocation2 + $0x38] sm:$0xff] %vm24_vm2, %v2334_v8  ;;  %535 = vperm.xlu1 %1693, %v2295_v44  }
 0x1c1   :  { %1035 = vst.msk [vmem:[#allocation2 + $0x30] sm:$0xff] %vm24_vm2, %v2337_v18  ;;  %v443_v1 = vpop.xlane.xlu1 %442  ;;  %v441_v9 = vpop.xlane.xlu0 %440 }
 0x1c2   :  { %v2353_v0 = vmax.f32 %v2339_v58, %v443_v1  ;;  %v2356_v63 = vmax.f32 %v2341_v55, %v441_v9  ;;  %v641_v1 = vld [vmem:[%s2987_s0 + $0x28] sm:$0xff]  ;;  %v643_v9 = vld [vmem:[%s2987_s0 + $0x38] sm:$0xff] }
 0x1c4   :  { %3021 = vst [vmem:[#allocation15_spill] sm:$0xff] %v2353_v0  ;;  %3022 = vst [vmem:[#allocation16_spill] sm:$0xff] %v2356_v63  ;;  %530 = vperm.xlu1 %1693, %v2298_v49   ;;  %585 = vperm.xlu0 %1694, %v2353_v0  }
 0x1c5   :  { %1044 = vst.msk [vmem:[#allocation2 + $0x78] sm:$0xff] %vm24_vm2, %v2353_v0  ;;  %1043 = vst.msk [vmem:[#allocation2 + $0x70] sm:$0xff] %vm24_vm2, %v2356_v63 }
 0x1c8   :  { %570 = vperm.xlu1 %1693, %v2317_v20   ;;  %669 = vperm.xlu0 %1694, %v641_v1   ;;  %v640_v1 = vld [vmem:[%s2987_s0 + $0x20] sm:$0xff] }
 0x1cc   :  { %545 = vperm.xlu1 %1693, %v2334_v8   ;;  %675 = vperm.xlu0 %1694, %v643_v9   ;;  %v649_v9 = vld [vmem:[%s2987_s0 + $0x68] sm:$0xff] }
 0x1d0   :  { %540 = vperm.xlu1 %1693, %v2337_v18   ;;  %681 = vperm.xlu0 %1694, %v645_v3   ;;  %v642_v3 = vld [vmem:[%s2987_s0 + $0x30] sm:$0xff] }
 0x1d4   :  { %580 = vperm.xlu1 %1693, %v2356_v63   ;;  %687 = vperm.xlu0 %1694, %v647_v2   ;;  %v644_v2 = vld [vmem:[%s2987_s0 + $0x40] sm:$0xff] }
 0x1d8   :  { %666 = vperm.xlu1 %1693, %v640_v1   ;;  %693 = vperm.xlu0 %1694, %v649_v9   ;;  %v646_v1 = vld [vmem:[%s2987_s0 + $0x50] sm:$0xff]  ;;  %v648_v9 = vld [vmem:[%s2987_s0 + $0x60] sm:$0xff] }
 0x1dc   :  { %672 = vperm.xlu1 %1693, %v642_v3   ;;  %699 = vperm.xlu0 %1694, %v651_v56   ;;  %v650_v3 = vld [vmem:[%s2987_s0 + $0x70] sm:$0xff]  ;;  %v736_v56 = vadd.s32 16, %v2082_v16 }
 0x1de   :  { %vm773_vm12 = vcmp.ne.s32.totalorder %v736_v56, %v2084_v17 }
 0x1df   :  { %vm2414_vm14 = vmand %vm773_vm12, %vm787_vm3 }
 0x1e0   :  { %678 = vperm.xlu1 %1693, %v644_v2   ;;  %vm854_vm15 = vmand %vm707_vm13, %vm2414_vm14 }
 0x1e4   :  { %684 = vperm.xlu1 %1693, %v646_v1   ;;  %v870_v1 = vsel %vm854_vm15, %v2144_v34, 0.0  ;;  %vm782_vm15 = vcmp.ne.s32.totalorder %v745_v11, %v2084_v17  ;;  %v742_v11 = vadd.s32 64, %v2082_v16 }
 0x1e6   :  { %vm779_vm6 = vcmp.ne.s32.totalorder %v742_v11, %v2084_v17 }
 0x1e8   :  { %690 = vperm.xlu1 %1693, %v648_v9   ;;  %v737_v9 = vadd.s32 24, %v2082_v16 }
 0x1ea   :  { %vm774_vm0 = vcmp.ne.s32.totalorder %v737_v9, %v2084_v17 }
 0x1eb   :  { %vm2431_vm4 = vmand %vm774_vm0, %vm787_vm3 }
 0x1ec   :  { %696 = vperm.xlu1 %1693, %v650_v3   ;;  %vm855_vm5 = vmand %vm708_vm1, %vm2431_vm4 }
 0x1fb   :  { %884 = vadd.xlane.f32.xlu0 %v868_v31  ;;  %v871_v31 = vsel %vm855_vm5, %v2138_v32, 0.0 }
 0x1ff   :  { %888 = vadd.xlane.f32.xlu0 %v870_v1 }
 0x210   :  { %886 = vadd.xlane.f32.xlu1 %v869_v30 }
 0x214   :  { %890 = vadd.xlane.f32.xlu1 %v871_v31 }
 0x227   :  { %v516_v46 = vpop.permute.xlu1 %515  ;;  %v556_v3 = vpop.permute.xlu0 %555 }
 0x228   :  { %v597_v63 = vsub.f32 %v2124_v27, %v556_v3  ;;  %v743_v3 = vadd.s32 72, %v2082_v16 }
 0x22a   :  { %v622_v24 = vmul.f32 1.442695, %v597_v63  ;;  %vm780_vm11 = vcmp.ne.s32.totalorder %v743_v3, %v2084_v17 }
 0x22b   :  { %v511_v1 = vpop.permute.xlu0 %510  ;;  %vm2470_vm13 = vmand %vm780_vm11, %vm787_vm3 }
 0x22c   :  { %v588_v30 = vsub.f32 %v2126_v28, %v511_v1  ;;  %1695 = vpow2.f32 %v622_v24  ;;  %vm2527_vm11 = vmand %vm779_vm6, %vm787_vm3  ;;  %v749_v28 = vadd.s32 120, %v2082_v16 }
 0x22e   :  { %v604_v31 = vmul.f32 1.442695, %v588_v30 }
 0x22f   :  { %v551_v45 = vpop.permute.xlu1 %550  ;;  %v566_v55 = vpop.permute.xlu0 %565 }
 0x230   :  { %1697 = vpow2.f32 %v604_v31  ;;  %v599_v63 = vsub.f32 %v2140_v33, %v566_v55  ;;  %v596_v31 = vsub.f32 %v2130_v29, %v551_v45 }
 0x232   :  { %v626_v57 = vmul.f32 1.442695, %v599_v63 }
 0x233   :  { %v526_v56 = vpop.permute.xlu1 %525 }
 0x234   :  { %v591_v49 = vsub.f32 %v2138_v32, %v526_v56  ;;  %v589_v32 = vsub.f32 %v2122_v26, %v516_v46 }
 0x236   :  { %v610_v58 = vmul.f32 1.442695, %v591_v49  ;;  %v1696_v56 = vpop.eup %1695  ;;  %v606_v46 = vmul.f32 1.442695, %v589_v32 }
 0x237   :  { %v521_v9 = vpop.permute.xlu1 %520  ;;  %v813_v3 = vsel %vm2470_vm13, %v1696_v56, 0.0 }
 0x238   :  { %1699 = vpow2.f32 %v610_v58 }
 0x239   :  { %1701 = vpow2.f32 %v626_v57 }
 0x23a   :  { %1703 = vpow2.f32 %v606_v46 }
 0x23b   :  { %v2443_v18 = vpop.permute.xlu1 %560  ;;  %v576_v15 = vpop.permute.xlu0 %575 }
 0x23c   :  { %v601_v58 = vsub.f32 %v2150_v37, %v576_v15  ;;  %v738_v15 = vadd.s32 32, %v2082_v16 }
 0x23e   :  { %v630_v32 = vmul.f32 1.442695, %v601_v58  ;;  %vm775_vm0 = vcmp.ne.s32.totalorder %v738_v15, %v2084_v17 }
 0x23f   :  { %v536_v20 = vpop.permute.xlu1 %535  ;;  %vm2505_vm5 = vmand %vm775_vm0, %vm787_vm3 }
 0x240   :  { %v593_v55 = vsub.f32 %v2148_v36, %v536_v20 }
 0x242   :  { %v614_v20 = vmul.f32 1.442695, %v593_v55 }
 0x243   :  { %v586_v14 = vpop.permute.xlu0 %585  ;;  %v2448_v0 = vpop.permute.xlu1 %530 }
 0x244   :  { %1705 = vpow2.f32 %v614_v20  ;;  %v3059_v20 = vsub.f32 %v2263_v7, %v2279_v12  ;;  %v3063_v7 = vld [vmem:[#allocation13_spill] sm:$0xff]  ;;  %v3064_v12 = vld [vmem:[#allocation15_spill] sm:$0xff] }
 0x247   :  { %v670_v1 = vpop.permute.xlu0 %669  ;;  %v2459_v24 = vpop.permute.xlu1 %570 }
 0x248   :  { %vm710_vm10 = vcmp.eq.s32.totalorder %v670_v1, %v2090_v19  ;;  %v620_v1 = vmul.f32 1.442695, %v596_v31 }
 0x249   :  { %vm857_vm12 = vmand %vm710_vm10, %vm2455_vm8  ;;  %vm784_vm10 = vcmp.ne.s32.totalorder %v747_v25, %v2084_v17 }
 0x24a   :  { %v873_v49 = vsel %vm857_vm12, %v2148_v36, 0.0  ;;  %v1698_v36 = vpop.eup %1697  ;;  %1707 = vpow2.f32 %v620_v1  ;;  %vm2534_vm12 = vmand %vm784_vm10, %vm787_vm3 }
 0x24b   :  { %894 = vadd.xlane.f32.xlu1 %v873_v49  ;;  %v546_v30 = vpop.permute.xlu1 %545  ;;  %v590_v49 = vsub.f32 %v2144_v34, %v521_v9  ;;  %v804_v57 = vsel %vm2106_vm9, %v1698_v36, 0.0  ;;  %v1700_v55 = vpop.eup %1699  ;;  %v598_v34 = vsub.f32 %v2146_v35, %v2443_v18  ;;  %1709 = vpow2.f32 %v630_v32  ;;  %vm2497_vm9 = vmand %vm782_vm15, %vm787_vm3 }
 0x24c   :  { %v595_v45 = vsub.f32 %v2158_v40, %v546_v30  ;;  %v603_v9 = vsub.f32 %v2160_v41, %v586_v14  ;;  %v807_v23 = vsel %vm2431_vm4, %v1700_v55, 0.0  ;;  %v1702_v31 = vpop.eup %1701  ;;  %v592_v36 = vsub.f32 %v2154_v38, %v2448_v0  ;;  %v676_v15 = vpop.permute.xlu0 %675 }
 0x24d   :  { %v608_v46 = vmul.f32 1.442695, %v590_v49  ;;  %v624_v18 = vmul.f32 1.442695, %v598_v34  ;;  %v1704_v1 = vpop.eup %1703  ;;  %v815_v49 = vsel %vm2497_vm9, %v1702_v31, 0.0  ;;  %vm786_vm15 = vcmp.ne.s32.totalorder %v749_v28, %v2084_v17 }
 0x24e   :  { %v618_v30 = vmul.f32 1.442695, %v595_v45  ;;  %v1706_v45 = vpop.eup %1705  ;;  %v612_v0 = vmul.f32 1.442695, %v592_v36  ;;  %vm712_vm6 = vcmp.eq.s32.totalorder %v676_v15, %v2090_v19 }
 0x24f   :  { %838 = vadd.xlane.f32.xlu1 %v813_v3  ;;  %v2478_v63 = vpop.permute.xlu1 %540  ;;  %1711 = vpow2.f32 %v608_v46  ;;  %v634_v3 = vmul.f32 1.442695, %v603_v9  ;;  %v809_v46 = vsel %vm2455_vm8, %v1706_v45, 0.0  ;;  %v741_v9 = vadd.s32 56, %v2082_v16 }
 0x250   :  { %1713 = vpow2.f32 %v618_v30  ;;  %v594_v31 = vsub.f32 %v2164_v42, %v2478_v63  ;;  %v682_v11 = vpop.permute.xlu0 %681  ;;  %vm781_vm8 = vcmp.ne.s32.totalorder %v744_v22, %v2084_v17 }
 0x251   :  { %1715 = vpow2.f32 %v624_v18 }
 0x252   :  { %1717 = vpow2.f32 %v634_v3  ;;  %v616_v36 = vmul.f32 1.442695, %v594_v31  ;;  %v3054_v31 = vsub.f32 %v2244_v62, %v2259_v5  ;;  %v916_v5 = vld [vmem:[#allocation3] sm:$0xff] }
 0x253   :  { %820 = vadd.xlane.f32.xlu1 %v804_v57  ;;  %v2486_v56 = vpop.permute.xlu1 %580  ;;  %v600_v57 = vsub.f32 %v2156_v39, %v2459_v24  ;;  %1719 = vpow2.f32 %v612_v0 }
 0x254   :  { %v1708_v55 = vpop.eup %1707  ;;  %v602_v63 = vsub.f32 %v2166_v43, %v2486_v56  ;;  %v688_v2 = vpop.permute.xlu0 %687 }
 0x255   :  { %v1710_v30 = vpop.eup %1709  ;;  %v812_v25 = vsel %vm2527_vm11, %v1708_v55, 0.0  ;;  %v746_v55 = vadd.s32 96, %v2082_v16 }
 0x256   :  { %v817_v18 = vsel %vm2534_vm12, %v1710_v30, 0.0 }
 0x257   :  { %826 = vadd.xlane.f32.xlu1 %v807_v23  ;;  %v667_v58 = vpop.permute.xlu1 %666  ;;  %v628_v23 = vmul.f32 1.442695, %v600_v57  ;;  %vm783_vm10 = vcmp.ne.s32.totalorder %v746_v55, %v2084_v17  ;;  %v983_v57 = vld [vmem:[#allocation4 + $0x10] sm:$0xff] }
 0x258   :  { %vm709_vm1 = vcmp.eq.s32.totalorder %v667_v58, %v2090_v19  ;;  %v694_v22 = vpop.permute.xlu0 %693 }
 0x259   :  { %vm856_vm4 = vmand %vm709_vm1, %vm2505_vm5  ;;  %v1712_v58 = vpop.eup %1711  ;;  %1721 = vpow2.f32 %v628_v23 }
 0x25a   :  { %v872_v32 = vsel %vm856_vm4, %v2154_v38, 0.0  ;;  %v805_v38 = vsel %vm2099_vm7, %v1704_v1, 0.0  ;;  %vm778_vm7 = vcmp.ne.s32.totalorder %v741_v9, %v2084_v17  ;;  %v1714_v3 = vpop.eup %1713  ;;  %v806_v45 = vsel %vm2414_vm14, %v1712_v58, 0.0  ;;  %vm2563_vm1 = vmand %vm781_vm8, %vm787_vm3 }
 0x25b   :  { %842 = vadd.xlane.f32.xlu1 %v815_v49  ;;  %892 = vadd.xlane.f32.xlu0 %v872_v32  ;;  %vm2553_vm0 = vmand %vm778_vm7, %vm787_vm3  ;;  %v1716_v49 = vpop.eup %1715  ;;  %1723 = vpow2.f32 %v616_v36  ;;  %vm714_vm7 = vcmp.eq.s32.totalorder %v682_v11, %v2090_v19  ;;  %v673_v15 = vpop.permute.xlu1 %672  ;;  %v740_v58 = vadd.s32 48, %v2082_v16  ;;  %v748_v11 = vadd.s32 112, %v2082_v16 }
 0x25c   :  { %v811_v32 = vsel %vm2553_vm0, %v1714_v3, 0.0  ;;  %v1718_v56 = vpop.eup %1717  ;;  %vm2569_vm4 = vmand %vm786_vm15, %vm787_vm3  ;;  %v814_v9 = vsel %vm2563_vm1, %v1716_v49, 0.0  ;;  %v700_v16 = vpop.permute.xlu0 %699 }
 0x25d   :  { %v1720_v30 = vpop.eup %1719  ;;  %vm859_vm14 = vmand %vm712_vm6, %vm2553_vm0  ;;  %vm716_vm0 = vcmp.eq.s32.totalorder %v688_v2, %v2090_v19  ;;  %v982_v2 = vld [vmem:[#allocation4 + $0x8] sm:$0xff] }
 0x25e   :  { %v875_v28 = vsel %vm859_vm14, %v2158_v40, 0.0  ;;  %v808_v23 = vsel %vm2505_vm5, %v1720_v30, 0.0  ;;  %vm2588_vm8 = vmand %vm783_vm10, %vm787_vm3  ;;  %vm777_vm5 = vcmp.ne.s32.totalorder %v740_v58, %v2084_v17  ;;  %vm718_vm14 = vcmp.eq.s32.totalorder %v694_v22, %v2090_v19 }
 0x25f   :  { %830 = vadd.xlane.f32.xlu1 %v809_v46  ;;  %822 = vadd.xlane.f32.xlu0 %v805_v38  ;;  %v632_v46 = vmul.f32 1.442695, %v602_v63  ;;  %v819_v38 = vsel %vm2569_vm4, %v1718_v56, 0.0  ;;  %vm861_vm15 = vmand %vm714_vm7, %vm2470_vm13  ;;  %v679_v3 = vpop.permute.xlu1 %678  ;;  %vm785_vm13 = vcmp.ne.s32.totalorder %v748_v11, %v2084_v17  ;;  %v3051_v30 = vsub.f32 %v2214_v48, %v2220_v52  ;;  %v925_v48 = vld [vmem:[#allocation3 + $0x48] sm:$0xff] }
 0x260   :  { %v877_v40 = vsel %vm861_vm15, %v2124_v27, 0.0  ;;  %vm863_vm6 = vmand %vm716_vm0, %vm2497_vm9  ;;  %vm720_vm9 = vcmp.eq.s32.totalorder %v700_v16, %v2090_v19  ;;  %vm711_vm0 = vcmp.eq.s32.totalorder %v673_v15, %v2090_v19  ;;  %v498_v58 = vmul.f32 1.442695, %v3054_v31 }
 0x261   :  { %1725 = vpow2.f32 %v632_v46  ;;  %vm2607_vm10 = vmand %vm777_vm5, %vm787_vm3  ;;  %v879_v26 = vsel %vm863_vm6, %v2140_v33, 0.0  ;;  %vm713_vm6 = vcmp.eq.s32.totalorder %v679_v3, %v2090_v19  ;;  %v494_v15 = vmul.f32 1.442695, %v3051_v30 }
 0x262   :  { %vm2616_vm7 = vmand %vm785_vm13, %vm787_vm3  ;;  %v3055_v52 = vsub.f32 %v2212_v47, %v2217_v51  ;;  %v3057_v3 = vsub.f32 %v2242_v61, %v2256_v4  ;;  %v3058_v47 = vsub.f32 %v2300_v50, %v2314_v10  ;;  %v3060_v61 = vsub.f32 %v2319_v21, %v2334_v8 }
 0x263   :  { %846 = vadd.xlane.f32.xlu1 %v817_v18  ;;  %836 = vadd.xlane.f32.xlu0 %v812_v25  ;;  %v1722_v18 = vpop.eup %1721  ;;  %vm865_vm15 = vmand %vm718_vm14, %vm2534_vm12  ;;  %v685_v33 = vpop.permute.xlu1 %684  ;;  %1727 = vpow2.f32 %v494_v15 }
 0x264   :  { %v816_v14 = vsel %vm2588_vm8, %v1722_v18, 0.0  ;;  %v881_v1 = vsel %vm865_vm15, %v2150_v37, 0.0  ;;  %vm867_vm3 = vmand %vm720_vm9, %vm2569_vm4  ;;  %vm715_vm13 = vcmp.eq.s32.totalorder %v685_v33, %v2090_v19  ;;  %v986_v18 = vld [vmem:[#allocation4 + $0x28] sm:$0xff]  ;;  %v492_v16 = vmul.f32 1.442695, %v3057_v3 }
 0x265   :  { %v1724_v25 = vpop.eup %1723  ;;  %vm858_vm5 = vmand %vm711_vm0, %vm2607_vm10  ;;  %v883_v24 = vsel %vm867_vm3, %v2160_v41, 0.0  ;;  %v502_v51 = vmul.f32 1.442695, %v3058_v47  ;;  %v490_v4 = vmul.f32 1.442695, %v3060_v61  ;;  %v918_v61 = vld [vmem:[#allocation3 + $0x10] sm:$0xff] }
 0x266   :  { %v810_v36 = vsel %vm2607_vm10, %v1724_v25, 0.0  ;;  %v874_v49 = vsel %vm858_vm5, %v2164_v42, 0.0  ;;  %vm860_vm12 = vmand %vm713_vm6, %vm2527_vm11  ;;  %v981_v42 = vld [vmem:[#allocation4] sm:$0xff] }
 0x267   :  { %834 = vadd.xlane.f32.xlu1 %v811_v32  ;;  %824 = vadd.xlane.f32.xlu0 %v806_v45  ;;  %v691_v32 = vpop.permute.xlu1 %690  ;;  %v876_v37 = vsel %vm860_vm12, %v2130_v29, 0.0  ;;  %vm862_vm4 = vmand %vm715_vm13, %vm2563_vm1 }
 0x268   :  { %vm717_vm14 = vcmp.eq.s32.totalorder %v691_v32, %v2090_v19  ;;  %v878_v41 = vsel %vm862_vm4, %v2146_v35, 0.0 }
 0x269   :  { %vm864_vm10 = vmand %vm717_vm14, %vm2588_vm8 }
 0x26a   :  { %v880_v29 = vsel %vm864_vm10, %v2156_v39, 0.0 }
 0x26b   :  { %850 = vadd.xlane.f32.xlu1 %v819_v38  ;;  %840 = vadd.xlane.f32.xlu0 %v814_v9  ;;  %v1726_v63 = vpop.eup %1725  ;;  %v697_v45 = vpop.permute.xlu1 %696  ;;  %v984_v38 = vld [vmem:[#allocation4 + $0x18] sm:$0xff] }
 0x26c   :  { %v818_v17 = vsel %vm2616_vm7, %v1726_v63, 0.0  ;;  %vm719_vm11 = vcmp.eq.s32.totalorder %v697_v45, %v2090_v19  ;;  %v480_v63 = vmul.f32 1.442695, %v3059_v20  ;;  %v3065_v45 = vsub.f32 %v3063_v7, %v3064_v12  ;;  %v926_v7 = vld [vmem:[#allocation3 + $0x50] sm:$0xff]  ;;  %v2746_v12 = vld [vmem:[%s2989_s2 + $0x48] sm:$0xff] }
 0x26d   :  { %vm866_vm1 = vmand %vm719_vm11, %vm2616_vm7  ;;  %v1728_v11 = vpop.eup %1727  ;;  %vm1365_vm0 = vcmp.lt.f32.partialorder %v2746_v12, 1e-06 }
 0x26e   :  { %v882_v55 = vsel %vm866_vm1, %v2166_v43, 0.0  ;;  %v3052_v43 = vsub.f32 %v2222_v53, %v2237_v59  ;;  %v3056_v59 = vsub.f32 %v2281_v13, %v2295_v44 }
 0x26f   :  { %898 = vadd.xlane.f32.xlu1 %v875_v28  ;;  %828 = vadd.xlane.f32.xlu0 %v808_v23  ;;  %v3053_v28 = vsub.f32 %v2224_v54, %v2240_v60  ;;  %v941_v60 = vmul.f32 %v1728_v11, %v925_v48  ;;  %v3072_v11 = vld [vmem:[#allocation11_spill] sm:$0xff] }
 0x270   :  { %v476_v22 = vmul.f32 1.442695, %v3052_v43  ;;  %v486_v54 = vmul.f32 1.442695, %v3056_v59 }
 0x271   :  { %v482_v23 = vmul.f32 1.442695, %v3053_v28 }
 0x272   :  { %1729 = vpow2.f32 %v476_v22  ;;  %v2707_v22 = vld [vmem:[%s2989_s2 + $0x18] sm:$0xff] }
 0x273   :  { %902 = vadd.xlane.f32.xlu1 %v877_v40  ;;  %844 = vadd.xlane.f32.xlu0 %v816_v14  ;;  %1731 = vpow2.f32 %v482_v23  ;;  %v478_v14 = vmul.f32 1.442695, %v3055_v52  ;;  %vm1359_vm7 = vcmp.lt.f32.partialorder %v2707_v22, 1e-06 }
 0x274   :  { %1733 = vpow2.f32 %v498_v58  ;;  %v924_v58 = vld [vmem:[#allocation3 + $0x40] sm:$0xff]  ;;  %v1375_v20 = vsel %vm1359_vm7, 1.0, %v2707_v22 }
 0x275   :  { %1735 = vpow2.f32 %v478_v14  ;;  %v2718_v14 = vld [vmem:[%s2989_s2 + $0x8] sm:$0xff] }
 0x276   :  { %1737 = vpow2.f32 %v486_v54  ;;  %v929_v54 = vld [vmem:[#allocation3 + $0x68] sm:$0xff]  ;;  %vm1357_vm9 = vcmp.lt.f32.partialorder %v2718_v14, 1e-06 }
 0x277   :  { %906 = vadd.xlane.f32.xlu1 %v879_v26  ;;  %832 = vadd.xlane.f32.xlu0 %v810_v36  ;;  %v919_v36 = vld [vmem:[#allocation3 + $0x18] sm:$0xff]  ;;  %1739 = vpow2.f32 %v492_v16  ;;  %v2727_v16 = vld [vmem:[%s2989_s2 + $0x28] sm:$0xff] }
 0x278   :  { %1741 = vpow2.f32 %v502_v51  ;;  %vm1361_vm15 = vcmp.lt.f32.partialorder %v2727_v16, 1e-06 }
 0x279   :  { %1743 = vpow2.f32 %v480_v63 }
 0x27a   :  { %1745 = vpow2.f32 %v490_v4  ;;  %v923_v4 = vld [vmem:[#allocation3 + $0x38] sm:$0xff] }
 0x27b   :  { %910 = vadd.xlane.f32.xlu1 %v881_v1  ;;  %848 = vadd.xlane.f32.xlu0 %v818_v17  ;;  %v927_v17 = vld [vmem:[#allocation3 + $0x58] sm:$0xff] }
 0x27c   :  { %v1730_v25 = vpop.eup %1729 }
 0x27d   :  { %v932_v13 = vmul.f32 %v1730_v25, %v916_v5  ;;  %v1732_v44 = vpop.eup %1731  ;;  %v3076_v25 = vld [vmem:[#allocation16_spill] sm:$0xff] }
 0x27e   :  { %v935_v50 = vmul.f32 %v1732_v44, %v919_v36  ;;  %v1734_v10 = vpop.eup %1733 }
 0x27f   :  { %914 = vadd.xlane.f32.xlu1 %v883_v24  ;;  %896 = vadd.xlane.f32.xlu0 %v874_v49  ;;  %v3061_v24 = vld [vmem:[#allocation6_spill] sm:$0xff]  ;;  %v1736_v8 = vpop.eup %1735  ;;  %v943_v21 = vmul.f32 %v1734_v10, %v927_v17  ;;  %v1373_v17 = vsel %vm1357_vm9, 1.0, %v2718_v14 }
 0x280   :  { %v3062_v49 = vsub.f32 %v2261_v6, %v3061_v24 }
 0x282   :  { %v496_v32 = vmul.f32 1.442695, %v3062_v49  ;;  %v1377_v49 = vsel %vm1361_vm15, 1.0, %v2727_v16 }
 0x283   :  { %900 = vadd.xlane.f32.xlu0 %v876_v37 }
 0x284   :  { %1747 = vpow2.f32 %v496_v32 }
 0x287   :  { %904 = vadd.xlane.f32.xlu0 %v878_v41  ;;  %v506_v41 = vmul.f32 1.442695, %v3065_v45 }
 0x288   :  { %v885_v34 = vpop.xlane.xlu0 %884 }
 0x289   :  { %v997_v56 = vadd.f32 %v981_v42, %v885_v34  ;;  %v985_v42 = vld [vmem:[#allocation4 + $0x20] sm:$0xff]  ;;  %v1738_v34 = vpop.eup %1737  ;;  %1749 = vpow2.f32 %v506_v41  ;;  %v2751_v41 = vld [vmem:[%s2989_s2 + $0x10] sm:$0xff] }
 0x28a   :  { %v1740_v28 = vpop.eup %1739  ;;  %vm1358_vm5 = vcmp.lt.f32.partialorder %v2751_v41, 1e-06 }
 0x28b   :  { %1013 = vst.msk [vmem:[#allocation4] sm:$0xff] %vm24_vm2, %v997_v56  ;;  %908 = vadd.xlane.f32.xlu0 %v880_v29  ;;  %v3066_v56 = vld [vmem:[#allocation7_spill] sm:$0xff]  ;;  %v3067_v29 = vld [vmem:[#allocation8_spill] sm:$0xff]  ;;  %v940_v51 = vmul.f32 %v1740_v28, %v924_v58 }
 0x28c   :  { %v889_v0 = vpop.xlane.xlu0 %888 }
 0x28d   :  { %v999_v35 = vadd.f32 %v983_v57, %v889_v0  ;;  %v3068_v57 = vsub.f32 %v3066_v56, %v3067_v29 }
 0x28f   :  { %1015 = vst.msk [vmem:[#allocation4 + $0x10] sm:$0xff] %vm24_vm2, %v999_v35  ;;  %912 = vadd.xlane.f32.xlu0 %v882_v55  ;;  %v484_v0 = vmul.f32 1.442695, %v3068_v57  ;;  %v917_v55 = vld [vmem:[#allocation3 + $0x8] sm:$0xff] }
 0x290   :  { %v933_v23 = vmul.f32 %v1736_v8, %v917_v55 }
 0x29d   :  { %v887_v19 = vpop.xlane.xlu1 %886 }
 0x29e   :  { %v998_v46 = vadd.f32 %v982_v2, %v887_v19  ;;  %v921_v2 = vld [vmem:[#allocation3 + $0x28] sm:$0xff]  ;;  %v2699_v19 = vld [vmem:[%s2989_s2] sm:$0xff] }
 0x29f   :  { %v937_v31 = vmul.f32 %v1738_v34, %v921_v2  ;;  %vm1356_vm8 = vcmp.lt.f32.partialorder %v2699_v19, 1e-06  ;;  %v2757_v34 = vld [vmem:[%s2989_s2 + $0x58] sm:$0xff] }
 0x2a0   :  { %1014 = vst.msk [vmem:[#allocation4 + $0x8] sm:$0xff] %vm24_vm2, %v998_v46  ;;  %v1372_v44 = vsel %vm1356_vm8, 1.0, %v2699_v19  ;;  %vm1367_vm3 = vcmp.lt.f32.partialorder %v2757_v34, 1e-06 }
 0x2a1   :  { %v891_v39 = vpop.xlane.xlu1 %890  ;;  %v1383_v58 = vsel %vm1367_vm3, 1.0, %v2757_v34 }
 0x2a2   :  { %v1000_v9 = vadd.f32 %v984_v38, %v891_v39  ;;  %v3069_v39 = vld [vmem:[#allocation9_spill] sm:$0xff] }
 0x2a4   :  { %1016 = vst.msk [vmem:[#allocation4 + $0x18] sm:$0xff] %vm24_vm2, %v1000_v9  ;;  %v3070_v9 = vld [vmem:[#allocation10_spill] sm:$0xff] }
 0x2a5   :  { %v3071_v30 = vsub.f32 %v3069_v39, %v3070_v9  ;;  %v1260_v39 = vld [vmem:[#allocation2] sm:$0xff] }
 0x2a7   :  { %v500_v15 = vmul.f32 1.442695, %v3071_v30  ;;  %v1381_v30 = vsel %vm1365_vm0, 1.0, %v2746_v12 }
 0x2d8   :  { %v895_v40 = vpop.xlane.xlu1 %894 }
 0x2d9   :  { %v1002_v53 = vadd.f32 %v986_v18, %v895_v40  ;;  %v1742_v18 = vpop.eup %1741  ;;  %v3073_v40 = vld [vmem:[#allocation12_spill] sm:$0xff] }
 0x2da   :  { %v3074_v48 = vsub.f32 %v3072_v11, %v3073_v40 }
 0x2db   :  { %1018 = vst.msk [vmem:[#allocation4 + $0x28] sm:$0xff] %vm24_vm2, %v1002_v53 }
 0x2dc   :  { %v839_v62 = vpop.xlane.xlu1 %838  ;;  %v488_v52 = vmul.f32 1.442695, %v3074_v48 }
 0x2dd   :  { %v957_v27 = vadd.f32 %v941_v60, %v839_v62  ;;  %v3075_v60 = vld [vmem:[#allocation14_spill] sm:$0xff] }
 0x2de   :  { %v3077_v62 = vsub.f32 %v3075_v60, %v3076_v25  ;;  %v1374_v25 = vsel %vm1358_vm5, 1.0, %v2751_v41 }
 0x2df   :  { %974 = vst.msk [vmem:[#allocation3 + $0x48] sm:$0xff] %vm24_vm2, %v957_v27 }
 0x2e0   :  { %v821_v26 = vpop.xlane.xlu1 %820  ;;  %v504_v5 = vmul.f32 1.442695, %v3077_v62  ;;  %v988_v62 = vld [vmem:[#allocation4 + $0x38] sm:$0xff] }
 0x2e1   :  { %v948_v33 = vadd.f32 %v932_v13, %v821_v26  ;;  %v1744_v13 = vpop.eup %1743  ;;  %v945_v26 = vmul.f32 %v1742_v18, %v929_v54  ;;  %v2778_v18 = vld [vmem:[%s2989_s2 + $0x68] sm:$0xff] }
 0x2e2   :  { %v1746_v36 = vpop.eup %1745  ;;  %v934_v32 = vmul.f32 %v1744_v13, %v918_v61  ;;  %vm1369_vm12 = vcmp.lt.f32.partialorder %v2778_v18, 1e-06 }
 0x2e3   :  { %965 = vst.msk [vmem:[#allocation3] sm:$0xff] %vm24_vm2, %v948_v33  ;;  %v1748_v24 = vpop.eup %1747 }
 0x2e4   :  { %v827_v1 = vpop.xlane.xlu1 %826  ;;  %v1750_v45 = vpop.eup %1749 }
 0x2e5   :  { %v951_v37 = vadd.f32 %v935_v50, %v827_v1 }
 0x2e6   :  { %v1285_v50 = vld [vmem:[#allocation3 + $0x48] sm:$0xff] }
 0x2e7   :  { %968 = vst.msk [vmem:[#allocation3 + $0x18] sm:$0xff] %vm24_vm2, %v951_v37  ;;  %v939_v37 = vmul.f32 %v1746_v36, %v923_v4  ;;  %v2803_v4 = vld [vmem:[%s2989_s2 + $0x78] sm:$0xff] }
 0x2e8   :  { %v893_v35 = vpop.xlane.xlu0 %892  ;;  %v843_v6 = vpop.xlane.xlu1 %842  ;;  %vm1371_vm4 = vcmp.lt.f32.partialorder %v2803_v4, 1e-06 }
 0x2e9   :  { %v1001_v46 = vadd.f32 %v985_v42, %v893_v35  ;;  %v959_v38 = vadd.f32 %v943_v21, %v843_v6  ;;  %v931_v21 = vld [vmem:[#allocation3 + $0x78] sm:$0xff] }
 0x2ea   :  { %v1276_v43 = vld [vmem:[#allocation3] sm:$0xff]  ;;  %v947_v9 = vmul.f32 %v1750_v45, %v931_v21 }
 0x2eb   :  { %1751 = vlog2.f32 %v1276_v43  ;;  %1017 = vst.msk [vmem:[#allocation4 + $0x20] sm:$0xff] %vm24_vm2, %v1001_v46  ;;  %976 = vst.msk [vmem:[#allocation3 + $0x58] sm:$0xff] %vm24_vm2, %v959_v38  ;;  %v942_v38 = vmul.f32 %v1748_v24, %v926_v7  ;;  %v1391_v7 = vld [vmem:[#allocation4 + $0x18] sm:$0xff] }
 0x2ec   :  { %1753 = vpow2.f32 %v484_v0  ;;  %v823_v53 = vpop.xlane.xlu0 %822  ;;  %v831_v59 = vpop.xlane.xlu1 %830  ;;  %v2762_v0 = vld [vmem:[%s2989_s2 + $0x38] sm:$0xff] }
 0x2ed   :  { %v949_v3 = vadd.f32 %v933_v23, %v823_v53  ;;  %v953_v27 = vadd.f32 %v937_v31, %v831_v59  ;;  %1755 = vpow2.f32 %v500_v15  ;;  %v920_v31 = vld [vmem:[#allocation3 + $0x20] sm:$0xff]  ;;  %vm1363_vm6 = vcmp.lt.f32.partialorder %v2762_v0, 1e-06 }
 0x2ee   :  { %v1279_v47 = vld [vmem:[#allocation3 + $0x18] sm:$0xff] }
 0x2ef   :  { %1757 = vlog2.f32 %v1279_v47  ;;  %966 = vst.msk [vmem:[#allocation3 + $0x8] sm:$0xff] %vm24_vm2, %v949_v3  ;;  %970 = vst.msk [vmem:[#allocation3 + $0x28] sm:$0xff] %vm24_vm2, %v953_v27  ;;  %v1263_v3 = vld [vmem:[#allocation2 + $0x18] sm:$0xff]  ;;  %v1388_v27 = vld [vmem:[#allocation4] sm:$0xff] }
 0x2f0   :  { %1759 = vpow2.f32 %v488_v52  ;;  %v837_v63 = vpop.xlane.xlu0 %836  ;;  %v847_v33 = vpop.xlane.xlu1 %846  ;;  %v2783_v52 = vld [vmem:[%s2989_s2 + $0x20] sm:$0xff] }
 0x2f1   :  { %1761 = vpow2.f32 %v504_v5  ;;  %v956_v10 = vadd.f32 %v940_v51, %v837_v63  ;;  %v961_v1 = vadd.f32 %v945_v26, %v847_v33  ;;  %vm1360_vm13 = vcmp.lt.f32.partialorder %v2783_v52, 1e-06 }
 0x2f2   :  { %1763 = vrcp.f32 %v1372_v44  ;;  %v1287_v55 = vld [vmem:[#allocation3 + $0x58] sm:$0xff]  ;;  %v1376_v45 = vsel %vm1360_vm13, 1.0, %v2783_v52 }
 0x2f3   :  { %1765 = vrcp.f32 %v1375_v20  ;;  %973 = vst.msk [vmem:[#allocation3 + $0x40] sm:$0xff] %vm24_vm2, %v956_v10  ;;  %978 = vst.msk [vmem:[#allocation3 + $0x68] sm:$0xff] %vm24_vm2, %v961_v1  ;;  %v928_v20 = vld [vmem:[#allocation3 + $0x60] sm:$0xff] }
 0x2f4   :  { %1767 = vlog2.f32 %v1285_v50  ;;  %v825_v42 = vpop.xlane.xlu0 %824  ;;  %v835_v8 = vpop.xlane.xlu1 %834 }
 0x2f5   :  { %v1752_v56 = vpop.eup %1751  ;;  %1769 = vrcp.f32 %v1373_v17  ;;  %v950_v29 = vadd.f32 %v934_v32, %v825_v42  ;;  %v955_v57 = vadd.f32 %v939_v37, %v835_v8  ;;  %v1385_v32 = vsel %vm1369_vm12, 1.0, %v2778_v18 }
 0x2f6   :  { %v1754_v35 = vpop.eup %1753  ;;  %v1293_v6 = vmul.f32 0.6931472, %v1752_v56  ;;  %v1277_v2 = vld [vmem:[#allocation3 + $0x8] sm:$0xff]  ;;  %1771 = vrcp.f32 %v1377_v49 }
 0x2f7   :  { %v1281_v46 = vld [vmem:[#allocation3 + $0x28] sm:$0xff]  ;;  %1773 = vlog2.f32 %v1277_v2  ;;  %967 = vst.msk [vmem:[#allocation3 + $0x10] sm:$0xff] %vm24_vm2, %v950_v29  ;;  %972 = vst.msk [vmem:[#allocation3 + $0x38] sm:$0xff] %vm24_vm2, %v955_v57  ;;  %v1756_v15 = vpop.eup %1755  ;;  %v936_v47 = vmul.f32 %v1754_v35, %v920_v31  ;;  %v922_v35 = vld [vmem:[#allocation3 + $0x30] sm:$0xff] }
 0x2f8   :  { %v1324_v43 = vadd.f32 %v1293_v6, %v1260_v39  ;;  %1775 = vlog2.f32 %v1281_v46  ;;  %v841_v28 = vpop.xlane.xlu0 %840  ;;  %v851_v23 = vpop.xlane.xlu1 %850  ;;  %v990_v49 = vld [vmem:[#allocation4 + $0x48] sm:$0xff] }
 0x2f9   :  { %v1758_v11 = vpop.eup %1757  ;;  %1777 = vlog2.f32 %v1287_v55  ;;  %v958_v40 = vadd.f32 %v942_v38, %v841_v28  ;;  %v963_v48 = vadd.f32 %v947_v9, %v851_v23  ;;  %v1261_v28 = vld [vmem:[#allocation2 + $0x8] sm:$0xff] }
 0x2fa   :  { %v2785_v53 = vpop.eup %1759  ;;  %v1404_v59 = vmul.f32 %v2699_v19, %v1324_v43  ;;  %v1299_v54 = vmul.f32 0.6931472, %v1758_v11  ;;  %v1289_v60 = vld [vmem:[#allocation3 + $0x68] sm:$0xff]  ;;  %1779 = vrcp.f32 %v1381_v30  ;;  %v1379_v19 = vsel %vm1363_vm6, 1.0, %v2762_v0  ;;  %v1284_v56 = vld [vmem:[#allocation3 + $0x40] sm:$0xff] }
 0x2fb   :  { %v2791_v5 = vpop.eup %1761  ;;  %975 = vst.msk [vmem:[#allocation3 + $0x50] sm:$0xff] %vm24_vm2, %v958_v40  ;;  %980 = vst.msk [vmem:[#allocation3 + $0x78] sm:$0xff] %vm24_vm2, %v963_v48  ;;  %1781 = vrcp.f32 %v1383_v58  ;;  %v938_v31 = vmul.f32 %v2785_v53, %v922_v35  ;;  %v1387_v58 = vsel %vm1371_vm4, 1.0, %v2803_v4  ;;  %v2832_v11 = vld [vmem:[%s2989_s2 + $0x40] sm:$0xff]  ;;  %v1269_v48 = vld [vmem:[#allocation2 + $0x48] sm:$0xff] }
 0x2fc   :  { %v1764_v51 = vpop.eup %1763  ;;  %v1420_v13 = vsub.f32 %v1388_v27, %v1404_v59  ;;  %v1327_v44 = vadd.f32 %v1299_v54, %v1263_v3  ;;  %1783 = vlog2.f32 %v1289_v60  ;;  %v829_v26 = vpop.xlane.xlu0 %828  ;;  %v1265_v59 = vld [vmem:[#allocation2 + $0x28] sm:$0xff]  ;;  %v930_v3 = vld [vmem:[#allocation3 + $0x70] sm:$0xff]  ;;  %vm1364_vm14 = vcmp.lt.f32.partialorder %v2832_v11, 1e-06  ;;  %v996_v35 = vld [vmem:[#allocation4 + $0x78] sm:$0xff] }
 0x2fd   :  { %v899_v36 = vpop.xlane.xlu1 %898  ;;  %v1766_v63 = vpop.eup %1765  ;;  %1785 = vrcp.f32 %v1374_v25  ;;  %v952_v33 = vadd.f32 %v936_v47, %v829_v26 }
 0x2fe   :  { %v1004_v61 = vadd.f32 %v988_v62, %v899_v36  ;;  %v1768_v50 = vpop.eup %1767  ;;  %v1436_v10 = vmul.f32 -1.0, %v1420_v13  ;;  %v1407_v1 = vmul.f32 %v2707_v22, %v1327_v44  ;;  %v1278_v17 = vld [vmem:[#allocation3 + $0x10] sm:$0xff]  ;;  %v1283_v24 = vld [vmem:[#allocation3 + $0x38] sm:$0xff]  ;;  %1787 = vrcp.f32 %v1379_v19 }
 0x2ff   :  { %v2809_v37 = vpop.eup %1769  ;;  %1789 = vlog2.f32 %v1278_v17  ;;  %969 = vst.msk [vmem:[#allocation3 + $0x20] sm:$0xff] %vm24_vm2, %v952_v33  ;;  %v944_v22 = vmul.f32 %v1756_v15, %v928_v20  ;;  %v1311_v55 = vmul.f32 0.6931472, %v1768_v50  ;;  %v992_v15 = vld [vmem:[#allocation4 + $0x58] sm:$0xff] }
 0x300   :  { %1020 = vst.msk [vmem:[#allocation4 + $0x38] sm:$0xff] %vm24_vm2, %v1004_v61  ;;  %v2816_v42 = vpop.eup %1771  ;;  %v1453_v8 = vmul.f32 %v1764_v51, %v1436_v10  ;;  %v1423_v21 = vsub.f32 %v1391_v7, %v1407_v1  ;;  %1791 = vlog2.f32 %v1283_v24  ;;  %v845_v29 = vpop.xlane.xlu0 %844  ;;  %v1389_v61 = vld [vmem:[#allocation4 + $0x8] sm:$0xff]  ;;  %v946_v10 = vmul.f32 %v2791_v5, %v930_v3  ;;  %v1271_v17 = vld [vmem:[#allocation2 + $0x58] sm:$0xff] }
 0x301   :  { %v903_v57 = vpop.xlane.xlu1 %902  ;;  %v1774_v6 = vpop.eup %1773  ;;  %v960_v2 = vadd.f32 %v944_v22, %v845_v29  ;;  %1793 = vrcp.f32 %v1385_v32  ;;  %v1333_v19 = vadd.f32 %v1311_v55, %v1269_v48  ;;  %v1380_v1 = vsel %vm1364_vm14, 1.0, %v2832_v11  ;;  %v1393_v24 = vld [vmem:[#allocation4 + $0x28] sm:$0xff]  ;;  %v1262_v22 = vld [vmem:[#allocation2 + $0x10] sm:$0xff] }
 0x302   :  { %v1006_v46 = vadd.f32 %v990_v49, %v903_v57  ;;  %v1776_v38 = vpop.eup %1775  ;;  %1485 = vst.msk [vmem:[%s2990_s5] sm:$0xff] %vm24_vm2, %v1453_v8  ;;  %v1439_v39 = vmul.f32 -1.0, %v1423_v21  ;;  %v1295_v9 = vmul.f32 0.6931472, %v1774_v6  ;;  %v1291_v30 = vld [vmem:[#allocation3 + $0x78] sm:$0xff]  ;;  %1795 = vrcp.f32 %v1376_v45  ;;  %v1286_v47 = vld [vmem:[#allocation3 + $0x50] sm:$0xff] }
 0x303   :  { %v1778_v43 = vpop.eup %1777  ;;  %v1303_v23 = vmul.f32 0.6931472, %v1776_v38  ;;  %1797 = vlog2.f32 %v1284_v56  ;;  %977 = vst.msk [vmem:[#allocation3 + $0x60] sm:$0xff] %vm24_vm2, %v960_v2  ;;  %v1273_v8 = vld [vmem:[#allocation2 + $0x68] sm:$0xff]  ;;  %v1413_v56 = vmul.f32 %v2746_v12, %v1333_v19  ;;  %v987_v57 = vld [vmem:[#allocation4 + $0x30] sm:$0xff] }
 0x304   :  { %1022 = vst.msk [vmem:[#allocation4 + $0x48] sm:$0xff] %vm24_vm2, %v1006_v46  ;;  %v2834_v40 = vpop.eup %1779  ;;  %v1459_v54 = vmul.f32 %v1766_v63, %v1439_v39  ;;  %v1325_v60 = vadd.f32 %v1295_v9, %v1261_v28  ;;  %1799 = vlog2.f32 %v1291_v30  ;;  %v833_v25 = vpop.xlane.xlu0 %832  ;;  %v1315_v26 = vmul.f32 0.6931472, %v1778_v43  ;;  %v994_v63 = vld [vmem:[#allocation4 + $0x68] sm:$0xff]  ;;  %v2859_v9 = vld [vmem:[%s2989_s2 + $0x50] sm:$0xff] }
 0x305   :  { %v907_v62 = vpop.xlane.xlu1 %906  ;;  %v2837_v53 = vpop.eup %1781  ;;  %v1329_v27 = vadd.f32 %v1303_v23, %v1265_v59  ;;  %v954_v51 = vadd.f32 %v938_v31, %v833_v25  ;;  %1801 = vrcp.f32 %v1387_v58  ;;  %v2868_v28 = vld [vmem:[%s2989_s2 + $0x30] sm:$0xff]  ;;  %vm1366_vm10 = vcmp.lt.f32.partialorder %v2859_v9, 1e-06  ;;  %v1267_v31 = vld [vmem:[#allocation2 + $0x38] sm:$0xff] }
 0x306   :  { %v1008_v13 = vadd.f32 %v992_v15, %v907_v62  ;;  %v1784_v44 = vpop.eup %1783  ;;  %1488 = vst.msk [vmem:[%s2990_s5 + $0x18] sm:$0xff] %vm24_vm2, %v1459_v54  ;;  %v1405_v36 = vmul.f32 %v2718_v14, %v1325_v60  ;;  %v1280_v20 = vld [vmem:[#allocation3 + $0x20] sm:$0xff]  ;;  %v1335_v39 = vadd.f32 %v1315_v26, %v1271_v17  ;;  %vm1362_vm11 = vcmp.lt.f32.partialorder %v2868_v28, 1e-06 }
 0x307   :  { %v2844_v33 = vpop.eup %1785  ;;  %v1409_v50 = vmul.f32 %v2727_v16, %v1329_v27  ;;  %1803 = vlog2.f32 %v1280_v20  ;;  %971 = vst.msk [vmem:[#allocation3 + $0x30] sm:$0xff] %vm24_vm2, %v954_v51  ;;  %v1319_v32 = vmul.f32 0.6931472, %v1784_v44 }
 0x308   :  { %1024 = vst.msk [vmem:[#allocation4 + $0x58] sm:$0xff] %vm24_vm2, %v1008_v13  ;;  %v2853_v14 = vpop.eup %1787  ;;  %v1421_v49 = vsub.f32 %v1389_v61, %v1405_v36  ;;  %1805 = vlog2.f32 %v1286_v47  ;;  %v849_v7 = vpop.xlane.xlu0 %848  ;;  %v1415_v13 = vmul.f32 %v2757_v34, %v1335_v39  ;;  %v989_v36 = vld [vmem:[#allocation4 + $0x40] sm:$0xff] }
 0x309   :  { %v911_v16 = vpop.xlane.xlu1 %910  ;;  %v1790_v45 = vpop.eup %1789  ;;  %v1425_v21 = vsub.f32 %v1393_v24, %v1409_v50  ;;  %v962_v5 = vadd.f32 %v946_v10, %v849_v7  ;;  %1807 = vrcp.f32 %v1380_v1  ;;  %v1337_v59 = vadd.f32 %v1319_v32, %v1273_v8  ;;  %v1395_v10 = vld [vmem:[#allocation4 + $0x38] sm:$0xff] }
 0x30a   :  { %v1010_v29 = vadd.f32 %v994_v63, %v911_v16  ;;  %v1792_v6 = vpop.eup %1791  ;;  %v1437_v55 = vmul.f32 -1.0, %v1421_v49  ;;  %v1297_v2 = vmul.f32 0.6931472, %v1790_v45  ;;  %v1288_v46 = vld [vmem:[#allocation3 + $0x60] sm:$0xff]  ;;  %v1382_v24 = vsel %vm1366_vm10, 1.0, %v2859_v9  ;;  %v1275_v49 = vld [vmem:[#allocation2 + $0x78] sm:$0xff] }
 0x30b   :  { %v1397_v38 = vld [vmem:[#allocation4 + $0x48] sm:$0xff]  ;;  %v2861_v30 = vpop.eup %1793  ;;  %v1441_v15 = vmul.f32 -1.0, %v1425_v21  ;;  %v1307_v12 = vmul.f32 0.6931472, %v1792_v6  ;;  %979 = vst.msk [vmem:[#allocation3 + $0x70] sm:$0xff] %vm24_vm2, %v962_v5  ;;  %1809 = vlog2.f32 %v1288_v46  ;;  %v1417_v7 = vmul.f32 %v2778_v18, %v1337_v59  ;;  %v1268_v6 = vld [vmem:[#allocation2 + $0x40] sm:$0xff] }
 0x30c   :  { %v1429_v43 = vsub.f32 %v1397_v38, %v1413_v56  ;;  %1026 = vst.msk [vmem:[#allocation4 + $0x68] sm:$0xff] %vm24_vm2, %v1010_v29  ;;  %v2871_v23 = vpop.eup %1795  ;;  %v1455_v58 = vmul.f32 %v2809_v37, %v1437_v55  ;;  %v1326_v48 = vadd.f32 %v1297_v2, %v1262_v22  ;;  %v897_v54 = vpop.xlane.xlu0 %896  ;;  %v1378_v16 = vsel %vm1362_vm11, 1.0, %v2868_v28  ;;  %v991_v22 = vld [vmem:[#allocation4 + $0x50] sm:$0xff]  ;;  %v1264_v55 = vld [vmem:[#allocation2 + $0x20] sm:$0xff] }
 0x30d   :  { %v915_v60 = vpop.xlane.xlu1 %914  ;;  %v1798_v25 = vpop.eup %1797  ;;  %v1463_v62 = vmul.f32 %v2816_v42, %v1441_v15  ;;  %v1331_v3 = vadd.f32 %v1307_v12, %v1267_v31  ;;  %v1003_v47 = vadd.f32 %v987_v57, %v897_v54  ;;  %v1390_v42 = vld [vmem:[#allocation4 + $0x10] sm:$0xff] }
 0x30e   :  { %v1445_v27 = vmul.f32 -1.0, %v1429_v43  ;;  %v1800_v19 = vpop.eup %1799  ;;  %1486 = vst.msk [vmem:[%s2990_s5 + $0x8] sm:$0xff] %vm24_vm2, %v1455_v58  ;;  %v1406_v51 = vmul.f32 %v2751_v41, %v1326_v48  ;;  %v1282_v37 = vld [vmem:[#allocation3 + $0x30] sm:$0xff]  ;;  %v1012_v26 = vadd.f32 %v996_v35, %v915_v60  ;;  %v1309_v34 = vmul.f32 0.6931472, %v1798_v25  ;;  %v1392_v25 = vld [vmem:[#allocation4 + $0x20] sm:$0xff] }
 0x30f   :  { %v1399_v44 = vld [vmem:[#allocation4 + $0x58] sm:$0xff]  ;;  %1490 = vst.msk [vmem:[%s2990_s5 + $0x28] sm:$0xff] %vm24_vm2, %v1463_v62  ;;  %v1323_v20 = vmul.f32 0.6931472, %v1800_v19  ;;  %v1411_v63 = vmul.f32 %v2762_v0, %v1331_v3  ;;  %1811 = vlog2.f32 %v1282_v37  ;;  %1019 = vst.msk [vmem:[#allocation4 + $0x30] sm:$0xff] %vm24_vm2, %v1003_v47  ;;  %v2889_v41 = vpop.eup %1801  ;;  %v2898_v0 = vld [vmem:[%s2989_s2 + $0x60] sm:$0xff] }
 0x310   :  { %v1471_v61 = vmul.f32 %v2834_v40, %v1445_v27  ;;  %v1422_v50 = vsub.f32 %v1390_v42, %v1406_v51  ;;  %v1431_v1 = vsub.f32 %v1399_v44, %v1415_v13  ;;  %1028 = vst.msk [vmem:[#allocation4 + $0x78] sm:$0xff] %vm24_vm2, %v1012_v26  ;;  %v901_v17 = vpop.xlane.xlu0 %900  ;;  %vm1368_vm1 = vcmp.lt.f32.partialorder %v2898_v0, 1e-06  ;;  %v2918_v54 = vld [vmem:[%s2989_s2 + $0x70] sm:$0xff] }
 0x311   :  { %v1804_v40 = vpop.eup %1803  ;;  %v1427_v32 = vsub.f32 %v1395_v10, %v1411_v63  ;;  %v1005_v45 = vadd.f32 %v989_v36, %v901_v17  ;;  %v1339_v35 = vadd.f32 %v1323_v20, %v1275_v49  ;;  %v1332_v12 = vadd.f32 %v1309_v34, %v1268_v6  ;;  %v1270_v27 = vld [vmem:[#allocation2 + $0x50] sm:$0xff]  ;;  %v1272_v10 = vld [vmem:[#allocation2 + $0x60] sm:$0xff] }
 0x312   :  { %1494 = vst.msk [vmem:[%s2990_s5 + $0x48] sm:$0xff] %vm24_vm2, %v1471_v61  ;;  %v1806_v8 = vpop.eup %1805  ;;  %v1438_v21 = vmul.f32 -1.0, %v1422_v50  ;;  %v1301_v56 = vmul.f32 0.6931472, %v1804_v40  ;;  %v1447_v5 = vmul.f32 -1.0, %v1431_v1  ;;  %v1290_v29 = vld [vmem:[#allocation3 + $0x70] sm:$0xff] }
 0x313   :  { %v1401_v57 = vld [vmem:[#allocation4 + $0x68] sm:$0xff]  ;;  %v1443_v2 = vmul.f32 -1.0, %v1427_v32  ;;  %1813 = vlog2.f32 %v1290_v29  ;;  %1021 = vst.msk [vmem:[#allocation4 + $0x40] sm:$0xff] %vm24_vm2, %v1005_v45  ;;  %v2910_v18 = vpop.eup %1807  ;;  %v1313_v31 = vmul.f32 0.6931472, %v1806_v8  ;;  %v995_v63 = vld [vmem:[#allocation4 + $0x70] sm:$0xff] }
 0x314   :  { %v1433_v46 = vsub.f32 %v1401_v57, %v1417_v7  ;;  %v1457_v38 = vmul.f32 %v2844_v33, %v1438_v21  ;;  %v1328_v39 = vadd.f32 %v1301_v56, %v1264_v55  ;;  %v1475_v15 = vmul.f32 %v2837_v53, %v1447_v5  ;;  %v905_v43 = vpop.xlane.xlu0 %904  ;;  %v1266_v61 = vld [vmem:[#allocation2 + $0x30] sm:$0xff] }
 0x315   :  { %v1467_v58 = vmul.f32 %v2853_v14, %v1443_v2  ;;  %v1007_v59 = vadd.f32 %v991_v22, %v905_v43  ;;  %v1810_v60 = vpop.eup %1809  ;;  %v1419_v33 = vmul.f32 %v2803_v4, %v1339_v35  ;;  %1815 = vrcp.f32 %v1382_v24  ;;  %v993_v14 = vld [vmem:[#allocation4 + $0x60] sm:$0xff]  ;;  %v1274_v56 = vld [vmem:[#allocation2 + $0x70] sm:$0xff] }
 0x316   :  { %v1449_v48 = vmul.f32 -1.0, %v1433_v46  ;;  %1487 = vst.msk [vmem:[%s2990_s5 + $0x10] sm:$0xff] %vm24_vm2, %v1457_v38  ;;  %v1408_v53 = vmul.f32 %v2783_v52, %v1328_v39  ;;  %1496 = vst.msk [vmem:[%s2990_s5 + $0x58] sm:$0xff] %vm24_vm2, %v1475_v15  ;;  %1817 = vrcp.f32 %v1378_v16  ;;  %v1384_v52 = vsel %vm1368_vm1, 1.0, %v2898_v0 }
 0x317   :  { %1492 = vst.msk [vmem:[%s2990_s5 + $0x38] sm:$0xff] %vm24_vm2, %v1467_v58  ;;  %v1403_v3 = vld [vmem:[#allocation4 + $0x78] sm:$0xff]  ;;  %1023 = vst.msk [vmem:[#allocation4 + $0x50] sm:$0xff] %vm24_vm2, %v1007_v59  ;;  %vm1370_vm8 = vcmp.lt.f32.partialorder %v2918_v54, 1e-06  ;;  %v1334_v13 = vadd.f32 %v1313_v31, %v1270_v27  ;;  %1819 = vrcp.f32 %v1384_v52 }
 0x318   :  { %v1479_v62 = vmul.f32 %v2861_v30, %v1449_v48  ;;  %v1424_v4 = vsub.f32 %v1392_v25, %v1408_v53  ;;  %v1435_v47 = vsub.f32 %v1403_v3, %v1419_v33  ;;  %v909_v19 = vpop.xlane.xlu0 %908  ;;  %v1317_v37 = vmul.f32 0.6931472, %v1810_v60 }
 0x319   :  { %v1812_v51 = vpop.eup %1811  ;;  %v1412_v30 = vmul.f32 %v2832_v11, %v1332_v12  ;;  %v1009_v44 = vadd.f32 %v993_v14, %v909_v19  ;;  %v1386_v50 = vsel %vm1370_vm8, 1.0, %v2918_v54  ;;  %v1414_v32 = vmul.f32 %v2859_v9, %v1334_v13 }
 0x31a   :  { %1498 = vst.msk [vmem:[%s2990_s5 + $0x68] sm:$0xff] %vm24_vm2, %v1479_v62  ;;  %v1440_v26 = vmul.f32 -1.0, %v1424_v4  ;;  %v1305_v36 = vmul.f32 0.6931472, %v1812_v51  ;;  %v1451_v42 = vmul.f32 -1.0, %v1435_v47  ;;  %v1396_v20 = vld [vmem:[#allocation4 + $0x40] sm:$0xff]  ;;  %v1336_v7 = vadd.f32 %v1317_v37, %v1272_v10 }
 0x31b   :  { %v1428_v34 = vsub.f32 %v1396_v20, %v1412_v30  ;;  %1025 = vst.msk [vmem:[#allocation4 + $0x60] sm:$0xff] %vm24_vm2, %v1009_v44  ;;  %1821 = vrcp.f32 %v1386_v50 }
 0x31c   :  { %v1461_v1 = vmul.f32 %v2871_v23, %v1440_v26  ;;  %v1330_v11 = vadd.f32 %v1305_v36, %v1266_v61  ;;  %v1483_v17 = vmul.f32 %v2889_v41, %v1451_v42  ;;  %v913_v24 = vpop.xlane.xlu0 %912  ;;  %v1394_v41 = vld [vmem:[#allocation4 + $0x30] sm:$0xff]  ;;  %v1416_v57 = vmul.f32 %v2898_v0, %v1336_v7 }
 0x31d   :  { %v1814_v40 = vpop.eup %1813  ;;  %v1444_v49 = vmul.f32 -1.0, %v1428_v34  ;;  %v1011_v16 = vadd.f32 %v995_v63, %v913_v24 }
 0x31e   :  { %1489 = vst.msk [vmem:[%s2990_s5 + $0x20] sm:$0xff] %vm24_vm2, %v1461_v1  ;;  %v1321_v45 = vmul.f32 0.6931472, %v1814_v40  ;;  %v1410_v22 = vmul.f32 %v2868_v28, %v1330_v11  ;;  %1500 = vst.msk [vmem:[%s2990_s5 + $0x78] sm:$0xff] %vm24_vm2, %v1483_v17  ;;  %v1398_v23 = vld [vmem:[#allocation4 + $0x50] sm:$0xff] }
 0x31f   :  { %v1469_v9 = vmul.f32 %v2910_v18, %v1444_v49  ;;  %v1430_v8 = vsub.f32 %v1398_v23, %v1414_v32  ;;  %1027 = vst.msk [vmem:[#allocation4 + $0x70] sm:$0xff] %vm24_vm2, %v1011_v16  ;;  %v1816_v21 = vpop.eup %1815 }
 0x320   :  { %v1426_v5 = vsub.f32 %v1394_v41, %v1410_v22  ;;  %v1818_v29 = vpop.eup %1817  ;;  %v1338_v35 = vadd.f32 %v1321_v45, %v1274_v56 }
 0x321   :  { %1493 = vst.msk [vmem:[%s2990_s5 + $0x40] sm:$0xff] %vm24_vm2, %v1469_v9  ;;  %v1446_v28 = vmul.f32 -1.0, %v1430_v8  ;;  %v1820_v18 = vpop.eup %1819 }
 0x322   :  { %v1442_v6 = vmul.f32 -1.0, %v1426_v5  ;;  %v1400_v55 = vld [vmem:[#allocation4 + $0x60] sm:$0xff]  ;;  %v1418_v15 = vmul.f32 %v2918_v54, %v1338_v35 }
 0x323   :  { %v1473_v2 = vmul.f32 %v1816_v21, %v1446_v28  ;;  %v1432_v46 = vsub.f32 %v1400_v55, %v1416_v57 }
 0x324   :  { %v1465_v38 = vmul.f32 %v1818_v29, %v1442_v6 }
 0x325   :  { %1495 = vst.msk [vmem:[%s2990_s5 + $0x50] sm:$0xff] %vm24_vm2, %v1473_v2  ;;  %v1448_v39 = vmul.f32 -1.0, %v1432_v46  ;;  %v1822_v31 = vpop.eup %1821 }
 0x326   :  { %1491 = vst.msk [vmem:[%s2990_s5 + $0x30] sm:$0xff] %vm24_vm2, %v1465_v38  ;;  %v1402_v0 = vld [vmem:[#allocation4 + $0x70] sm:$0xff] }
 0x327   :  { %v1477_v12 = vmul.f32 %v1820_v18, %v1448_v39  ;;  %v1434_v43 = vsub.f32 %v1402_v0, %v1418_v15 }
 0x329   :  { %1497 = vst.msk [vmem:[%s2990_s5 + $0x60] sm:$0xff] %vm24_vm2, %v1477_v12  ;;  %v1450_v58 = vmul.f32 -1.0, %v1434_v43 }
 0x32b   :  { %v1481_v48 = vmul.f32 %v1822_v31, %v1450_v58 }
 0x32d   :  { %1499 = vst.msk [vmem:[%s2990_s5 + $0x70] sm:$0xff] %vm24_vm2, %v1481_v48 }

</bundles_post_ra>
